<compile_context>
chip_gen: v6e
topology: v6e:2x2x1
jax: 0.10.0
libtpu: 0.0.40
codegen_flags: <defaults>
</compile_context>

<pallas_src>
import jax
import jax.numpy as jnp
from jax.experimental import pallas as pl
from jax.experimental.pallas import tpu as pltpu

IN_FEATURES = 1000
H1, H2, H3 = 512, 256, 64
LANE = 128


def _round_up(x, m):
    return (x + m - 1) // m * m


def _cdiv(a, b):
    return (a + b - 1) // b


# ---------------------------------------------------------------------------
# Fused Pallas kernel: trunk (with layer-3 folded into heads) + all task heads
# ---------------------------------------------------------------------------

def _fused_mtl_kernel(x_ref, w1_ref, b1_ref, w2_ref, b2_ref, wf_ref, bf_ref, o_ref):
    """o = ReLU(ReLU(x@W1+b1)@W2+b2) @ W_fold + b_fold   (bf16 MXU, f32 accumulation)."""
    x = x_ref[...].astype(jnp.bfloat16)          # VPU cast, co-issues under the MXU
    h1 = jnp.dot(x, w1_ref[...], preferred_element_type=jnp.float32) + b1_ref[...]
    h1 = jnp.maximum(h1, 0.0).astype(jnp.bfloat16)
    h2 = jnp.dot(h1, w2_ref[...], preferred_element_type=jnp.float32) + b2_ref[...]
    h2 = jnp.maximum(h2, 0.0).astype(jnp.bfloat16)
    out = jnp.dot(h2, wf_ref[...], preferred_element_type=jnp.float32) + bf_ref[...]
    o_ref[...] = out.astype(o_ref.dtype)


def _full_spec(shape):
    """Full-extent block, constant index_map -> VMEM-resident across all grid steps."""
    nd = len(shape)
    return pl.BlockSpec(shape, lambda i, _nd=nd: (0,) * _nd)


def _fused_forward_padded(x_pad, kp, *, block_b):
    """x_pad: [B_pad, 1000] f32 (B_pad % block_b == 0). Returns [B_pad, N_PAD] f32."""
    b_pad, in_dim = x_pad.shape
    n_pad = kp["w_fold"].shape[1]
    grid = (b_pad // block_b,)

    flops = 2 * b_pad * (in_dim * H1 + H1 * H2 + H2 * n_pad)
    bytes_accessed = (
        b_pad * in_dim * 4                                   # x (f32 in)
        + b_pad * n_pad * 4                                  # out (f32)
        + (in_dim * H1 + H1 * H2 + H2 * n_pad) * 2           # bf16 weights
        + (H1 + H2 + n_pad) * 4                              # f32 biases
    )

    return pl.pallas_call(
        _fused_mtl_kernel,
        out_shape=jax.ShapeDtypeStruct((b_pad, n_pad), jnp.float32),
        grid=grid,
        in_specs=[
            pl.BlockSpec((block_b, in_dim), lambda i: (i, 0)),  # x tile (pipelined)
            _full_spec(kp["w1"].shape),                         # weights: VMEM-resident
            _full_spec(kp["b1"].shape),
            _full_spec(kp["w2"].shape),
            _full_spec(kp["b2"].shape),
            _full_spec(kp["w_fold"].shape),
            _full_spec(kp["b_fold"].shape),
        ],
        out_specs=pl.BlockSpec((block_b, n_pad), lambda i: (i, 0)),
        compiler_params=pltpu.CompilerParams(
            dimension_semantics=("parallel",),       # v7x can shard batch across TCs
            vmem_limit_bytes=32 * 1024 * 1024,       # raise v5e's 16 MiB default
        ),
        cost_estimate=pl.CostEstimate(
            flops=flops, transcendentals=0, bytes_accessed=bytes_accessed
        ),
    )(x_pad, kp["w1"], kp["b1"], kp["w2"], kp["b2"], kp["w_fold"], kp["b_fold"])


def _choose_tile(B, block_b):
    """Balanced batch tile: >=2 grid steps when B >= 16, minimal padding waste."""
    n_steps = _cdiv(B, block_b)
    if B >= 16:
        n_steps = max(n_steps, 2)
    return _round_up(_cdiv(B, n_steps), 8)


def multi_task_forward(x, kernel_params, num_classes_list, *, block_b=1024):
    """Full forward pass. x: [B, 1000] f32. Returns list of [B, num_classes_i] f32."""
    B = x.shape[0]
    tb = _choose_tile(B, block_b)
    b_pad = _round_up(B, tb)
    x_pad = x if b_pad == B else jnp.pad(x, ((0, b_pad - B), (0, 0)))
    out_pad = _fused_forward_padded(x_pad, kernel_params, block_b=tb)
    out = out_pad[:B]
    outputs, off = [], 0
    for nc in num_classes_list:
        outputs.append(out[:, off:off + nc])
        off += nc
    return outputs


# ---------------------------------------------------------------------------
# Parameter init (PyTorch nn.Linear default: U(-1/sqrt(fan_in), +)) + kernel prep
# ---------------------------------------------------------------------------

def _init_linear(key, fan_in, fan_out):
    kw, kb = jax.random.split(key)
    bound = 1.0 / jnp.sqrt(float(fan_in))
    w = jax.random.uniform(kw, (fan_in, fan_out), jnp.float32, -bound, bound)  # [in, out]
    b = jax.random.uniform(kb, (1, fan_out), jnp.float32, -bound, bound)
    return w, b


def init_params(key, num_classes_list):
    """f32 reference parameters matching the PyTorch module (pre-transposed [in,out])."""
    keys = jax.random.split(key, 3 + len(num_classes_list))
    w1, b1 = _init_linear(keys[0], IN_FEATURES, H1)
    w2, b2 = _init_linear(keys[1], H1, H2)
    w3, b3 = _init_linear(keys[2], H2, H3)
    head_ws, head_bs = [], []
    for i, nc in enumerate(num_classes_list):
        w, b = _init_linear(keys[3 + i], H3, nc)
        head_ws.append(w)
        head_bs.append(b)
    return {
        "w1": w1, "b1": b1, "w2": w2, "b2": b2, "w3": w3, "b3": b3,
        "w_heads": jnp.concatenate(head_ws, axis=1),   # [64, total]
        "b_heads": jnp.concatenate(head_bs, axis=1),   # [1,  total]
    }


def prepare_kernel_params(params, num_classes_list):
    """Fold layer-3 into heads, pad head width to 128 lanes, cast weights to bf16."""
    total = int(sum(num_classes_list))
    n_pad = _round_up(max(total, LANE), LANE)

    # Fold: h3 = h2@W3 + b3 ; logits = h3@Wh + bh  ==>  logits = h2@(W3@Wh) + (b3@Wh + bh)
    w_fold = params["w3"] @ params["w_heads"]                       # [256, total]
    b_fold = params["b3"] @ params["w_heads"] + params["b_heads"]   # [1,   total]

    w_fold_p = jnp.pad(w_fold, ((0, 0), (0, n_pad - total)))
    b_fold_p = jnp.pad(b_fold, ((0, 0), (0, n_pad - total)))

    return {
        "w1": params["w1"].astype(jnp.bfloat16),        # [1000, 512] (K un-padded)
        "b1": params["b1"],
        "w2": params["w2"].astype(jnp.bfloat16),
        "b2": params["b2"],
        "w_fold": w_fold_p.astype(jnp.bfloat16),
        "b_fold": b_fold_p,
    }


# ---------------------------------------------------------------------------
# References for correctness checking
# ---------------------------------------------------------------------------

def reference_forward(x, params, num_classes_list):
    """Original-module semantics, full f32 precision."""
    h = jnp.maximum(x @ params["w1"] + params["b1"], 0.0)
    h = jnp.maximum(h @ params["w2"] + params["b2"], 0.0)
    h = h @ params["w3"] + params["b3"]
    out_cat = h @ params["w_heads"] + params["b_heads"]
    outputs, off = [], 0
    for nc in num_classes_list:
        outputs.append(out_cat[:, off:off + nc])
        off += nc
    return outputs


def folded_reference_forward(x, kp, num_classes_list):
    """Same folded / bf16 math as the kernel (tight numerical comparison)."""
    xb = x.astype(jnp.bfloat16)
    h1 = jnp.maximum(
        jnp.dot(xb, kp["w1"], preferred_element_type=jnp.float32) + kp["b1"], 0.0
    ).astype(jnp.bfloat16)
    h2 = jnp.maximum(
        jnp.dot(h1, kp["w2"], preferred_element_type=jnp.float32) + kp["b2"], 0.0
    ).astype(jnp.bfloat16)
    out_cat = jnp.dot(h2, kp["w_fold"], preferred_element_type=jnp.float32) + kp["b_fold"]
    outputs, off = [], 0
    for nc in num_classes_list:
        outputs.append(out_cat[:, off:off + nc])
        off += nc
    return outputs


# ---------------------------------------------------------------------------
# Main
# ---------------------------------------------------------------------------

if __name__ == "__main__":
    num_classes_list = [3, 5, 2]
    batch = 2

    key = jax.random.PRNGKey(0)
    k_params, k_x = jax.random.split(key)
    params = init_params(k_params, num_classes_list)
    kernel_params = prepare_kernel_params(params, num_classes_list)
    x = jax.random.normal(k_x, (batch, IN_FEATURES), jnp.float32)

    outs = multi_task_forward(x, kernel_params, num_classes_list)
    outs = [jax.block_until_ready(o) for o in outs]

    # Tight check vs. a reference doing the identical folded / bf16 math.
    refs_folded = folded_reference_forward(x, kernel_params, num_classes_list)
    # Loose check vs. the original-module f32 semantics (bf16 weights change rounding).
    refs_f32 = reference_forward(x, params, num_classes_list)

    for o, rf, r32, nc in zip(outs, refs_folded, refs_f32, num_classes_list):
        assert o.shape == (batch, nc), (o.shape, nc)
        assert jnp.allclose(o, rf, atol=1e-3, rtol=1e-3), "mismatch vs folded reference"
        assert jnp.allclose(o, r32, atol=3e-2, rtol=3e-2), "mismatch vs f32 reference"

    print("KERNEL_OK")
</pallas_src>

<mosaic_0001>
module attributes {stable_mosaic.version = 11 : i64} {
  func.func @_fused_mtl_kernel(%arg0: i32, %arg1: memref<8x1000xf32, #tpu.memory_space<vmem>>, %arg2: memref<1000x512xbf16, #tpu.memory_space<vmem>>, %arg3: memref<1x512xf32, #tpu.memory_space<vmem>>, %arg4: memref<512x256xbf16, #tpu.memory_space<vmem>>, %arg5: memref<1x256xf32, #tpu.memory_space<vmem>>, %arg6: memref<256x128xbf16, #tpu.memory_space<vmem>>, %arg7: memref<1x128xf32, #tpu.memory_space<vmem>>, %arg8: memref<8x128xf32, #tpu.memory_space<vmem>>) attributes {dimension_semantics = [#tpu.dimension_semantics<parallel>], iteration_bounds = array<i64: 1>, scalar_prefetch = 0 : i64, scratch_operands = 0 : i64, tpu.core_type = #tpu.core_type<tc>, window_params = [{transform_indices = @transform_0, window_bounds = array<i64: 8, 1000>}, {pipeline_mode = #tpu.pipeline_mode<synchronous>, transform_indices = @transform_1, window_bounds = array<i64: 1000, 512>}, {pipeline_mode = #tpu.pipeline_mode<synchronous>, transform_indices = @transform_2, window_bounds = array<i64: 1, 512>}, {pipeline_mode = #tpu.pipeline_mode<synchronous>, transform_indices = @transform_3, window_bounds = array<i64: 512, 256>}, {pipeline_mode = #tpu.pipeline_mode<synchronous>, transform_indices = @transform_4, window_bounds = array<i64: 1, 256>}, {pipeline_mode = #tpu.pipeline_mode<synchronous>, transform_indices = @transform_5, window_bounds = array<i64: 256, 128>}, {pipeline_mode = #tpu.pipeline_mode<synchronous>, transform_indices = @transform_6, window_bounds = array<i64: 1, 128>}, {transform_indices = @transform_7, window_bounds = array<i64: 8, 128>}]} {
    %c0 = arith.constant 0 : index
    %c0_0 = arith.constant 0 : index
    %0 = vector.load %arg1[%c0, %c0_0] : memref<8x1000xf32, #tpu.memory_space<vmem>>, vector<8x1000xf32>
    %1 = arith.truncf %0 : vector<8x1000xf32> to vector<8x1000xbf16>
    %c0_1 = arith.constant 0 : index
    %c0_2 = arith.constant 0 : index
    %2 = vector.load %arg2[%c0_1, %c0_2] : memref<1000x512xbf16, #tpu.memory_space<vmem>>, vector<1000x512xbf16>
    %cst = arith.constant dense<0.000000e+00> : vector<8x512xf32>
    %3 = tpu.matmul %1, %2, %cst {dimension_numbers = #tpu.dot_dimension_numbers<[1], [0], [0], [1], [0, 0, 1, 1], [], []>} : vector<8x1000xbf16>, vector<1000x512xbf16>, vector<8x512xf32> -> vector<8x512xf32>
    %c0_3 = arith.constant 0 : index
    %c0_4 = arith.constant 0 : index
    %4 = vector.load %arg3[%c0_3, %c0_4] : memref<1x512xf32, #tpu.memory_space<vmem>>, vector<1x512xf32>
    %5 = vector.broadcast %4 : vector<1x512xf32> to vector<8x512xf32>
    %6 = arith.addf %3, %5 : vector<8x512xf32>
    %cst_5 = arith.constant 0.000000e+00 : f32
    %7 = vector.broadcast %cst_5 : f32 to vector<8x512xf32>
    %8 = arith.maximumf %6, %7 : vector<8x512xf32>
    %9 = arith.truncf %8 : vector<8x512xf32> to vector<8x512xbf16>
    %c0_6 = arith.constant 0 : index
    %c0_7 = arith.constant 0 : index
    %10 = vector.load %arg4[%c0_6, %c0_7] : memref<512x256xbf16, #tpu.memory_space<vmem>>, vector<512x256xbf16>
    %cst_8 = arith.constant dense<0.000000e+00> : vector<8x256xf32>
    %11 = tpu.matmul %9, %10, %cst_8 {dimension_numbers = #tpu.dot_dimension_numbers<[1], [0], [0], [1], [0, 0, 1, 1], [], []>} : vector<8x512xbf16>, vector<512x256xbf16>, vector<8x256xf32> -> vector<8x256xf32>
    %c0_9 = arith.constant 0 : index
    %c0_10 = arith.constant 0 : index
    %12 = vector.load %arg5[%c0_9, %c0_10] : memref<1x256xf32, #tpu.memory_space<vmem>>, vector<1x256xf32>
    %13 = vector.broadcast %12 : vector<1x256xf32> to vector<8x256xf32>
    %14 = arith.addf %11, %13 : vector<8x256xf32>
    %cst_11 = arith.constant 0.000000e+00 : f32
    %15 = vector.broadcast %cst_11 : f32 to vector<8x256xf32>
    %16 = arith.maximumf %14, %15 : vector<8x256xf32>
    %17 = arith.truncf %16 : vector<8x256xf32> to vector<8x256xbf16>
    %c0_12 = arith.constant 0 : index
    %c0_13 = arith.constant 0 : index
    %18 = vector.load %arg6[%c0_12, %c0_13] : memref<256x128xbf16, #tpu.memory_space<vmem>>, vector<256x128xbf16>
    %cst_14 = arith.constant dense<0.000000e+00> : vector<8x128xf32>
    %19 = tpu.matmul %17, %18, %cst_14 {dimension_numbers = #tpu.dot_dimension_numbers<[1], [0], [0], [1], [0, 0, 1, 1], [], []>} : vector<8x256xbf16>, vector<256x128xbf16>, vector<8x128xf32> -> vector<8x128xf32>
    %c0_15 = arith.constant 0 : index
    %c0_16 = arith.constant 0 : index
    %20 = vector.load %arg7[%c0_15, %c0_16] : memref<1x128xf32, #tpu.memory_space<vmem>>, vector<1x128xf32>
    %21 = vector.broadcast %20 : vector<1x128xf32> to vector<8x128xf32>
    %22 = arith.addf %19, %21 : vector<8x128xf32>
    %c0_17 = arith.constant 0 : index
    %c0_18 = arith.constant 0 : index
    %23 = vector.load %arg8[%c0_17, %c0_18] : memref<8x128xf32, #tpu.memory_space<vmem>>, vector<8x128xf32>
    tpu.vector_store %arg8[%c0_17, %c0_18], %22 {strides = array<i32>} : memref<8x128xf32, #tpu.memory_space<vmem>>, vector<8x128xf32>,
    return
  }
  func.func @transform_0(%arg0: i32) -> (i32, i32) {
    %c0_i32 = arith.constant 0 : i32
    %c0_i32_0 = arith.constant 0 : i32
    return %arg0, %c0_i32 : i32, i32
  }
  func.func @transform_1(%arg0: i32) -> (i32, i32) {
    %c0_i32 = arith.constant 0 : i32
    %c0_i32_0 = arith.constant 0 : i32
    %c0_i32_1 = arith.constant 0 : i32
    return %c0_i32, %c0_i32_0 : i32, i32
  }
  func.func @transform_2(%arg0: i32) -> (i32, i32) {
    %c0_i32 = arith.constant 0 : i32
    %c0_i32_0 = arith.constant 0 : i32
    %c0_i32_1 = arith.constant 0 : i32
    return %c0_i32, %c0_i32_0 : i32, i32
  }
  func.func @transform_3(%arg0: i32) -> (i32, i32) {
    %c0_i32 = arith.constant 0 : i32
    %c0_i32_0 = arith.constant 0 : i32
    %c0_i32_1 = arith.constant 0 : i32
    return %c0_i32, %c0_i32_0 : i32, i32
  }
  func.func @transform_4(%arg0: i32) -> (i32, i32) {
    %c0_i32 = arith.constant 0 : i32
    %c0_i32_0 = arith.constant 0 : i32
    %c0_i32_1 = arith.constant 0 : i32
    return %c0_i32, %c0_i32_0 : i32, i32
  }
  func.func @transform_5(%arg0: i32) -> (i32, i32) {
    %c0_i32 = arith.constant 0 : i32
    %c0_i32_0 = arith.constant 0 : i32
    %c0_i32_1 = arith.constant 0 : i32
    return %c0_i32, %c0_i32_0 : i32, i32
  }
  func.func @transform_6(%arg0: i32) -> (i32, i32) {
    %c0_i32 = arith.constant 0 : i32
    %c0_i32_0 = arith.constant 0 : i32
    %c0_i32_1 = arith.constant 0 : i32
    return %c0_i32, %c0_i32_0 : i32, i32
  }
  func.func @transform_7(%arg0: i32) -> (i32, i32) {
    %c0_i32 = arith.constant 0 : i32
    %c0_i32_0 = arith.constant 0 : i32
    return %arg0, %c0_i32 : i32, i32
  }
}

</mosaic_0001>

<bundles_post_ra>
// kernel: tpu_custom_call.1
= control target key start
LH: loop header
LB: loop body
LE: loop exit
PB: predicated region body
PF: predicated region fallthrough
CT: control target
= control target key end

     0   :  { %12 = vsyncpa [#allocation3], 0  ;;  %s3791_s0 = inlined_call_operand.hbm [shape: f32[8,1000], index: 0, kind: input, shape index: {}]   ;;  %s3792_s1 = inlined_call_operand.hbm [shape: bf16[1000,512], index: 1, kind: input, shape index: {}]   ;;  %s3793_s2 = inlined_call_operand.hbm [shape: f32[1,512], index: 2, kind: input, shape index: {}]   ;;  %s3794_s3 = inlined_call_operand.hbm [shape: bf16[512,256], index: 3, kind: input, shape index: {}]   ;;  %s3795_s4 = inlined_call_operand.vmem [shape: f32[1,256], index: 4, kind: input, shape index: {}]   ;;  %s3796_s5 = inlined_call_operand.hbm [shape: bf16[256,128], index: 5, kind: input, shape index: {}]   ;;  %s3797_s6 = inlined_call_operand.vmem [shape: f32[1,128], index: 6, kind: input, shape index: {}]   ;;  %s3798_s7 = inlined_call_operand.hbm [shape: f32[8,128], index: 7, kind: output, shape index: {}]  }
   0x1   :  { %13 = vsyncpa [#allocation6], 0 }
   0x2   :  { %14 = vsyncpa [#allocation9], 0 }
   0x3   :  { %15 = vsyncpa [#allocation4], 0  ;;  %s3645_s24 = smov [#allocation5]  }
   0x4   :  { %s31_s25 = sshll.u32 %s3645_s24, 4  ;;  %s32_s25 = int_to_ptr.vmem [resolvable:$true] %s31_s25 }
   0x5   :  { %s3525_s26 = scalar_lea.vmem %s32_s25, 32000  ;;  %p3530_p1 = scmp.lt.s32.totalorder %s32_s25, %s32_s25 }
   0x6   :  { %p3526_p0 = scmp.ne.s32.totalorder %s32_s25, %s3525_s26  ;;  %p3531_p2 = scmp.lt.s32.totalorder %s3525_s26, %s3525_s26 }
   0x8   :  { %p3532_p3 = por %p3531_p2, %p3530_p1 }
   0xa   :  { %p3533_p4 = pnand %p3532_p3, %p3526_p0 }
   0xc   :  { %3536 = shalt.err (!%p3533_p4)
}
   0xd   :  { %s3646_s27 = smov 256   ;;  %s3647_s28 = smov 16  }
   0xe   :  { %37 = dma.hbm_to_vmem [thread:$0]  %s3792_s1, 32000, %s32_s25, [#allocation6], %s3646_s27, %s3646_s27, %s3647_s28  }
   0xf   :  { %s3648_s8 = smov [#allocation8]  }
  0x10   :  { %s53_s9 = sshll.u32 %s3648_s8, 4  ;;  %s54_s9 = int_to_ptr.vmem [resolvable:$true] %s53_s9 }
  0x11   :  { %s3545_s10 = scalar_lea.vmem %s54_s9, 8192  ;;  %p3550_p6 = scmp.lt.s32.totalorder %s54_s9, %s54_s9 }
  0x12   :  { %p3546_p5 = scmp.ne.s32.totalorder %s54_s9, %s3545_s10  ;;  %p3551_p7 = scmp.lt.s32.totalorder %s3545_s10, %s3545_s10 }
  0x14   :  { %p3552_p8 = por %p3551_p7, %p3550_p6 }
  0x16   :  { %p3553_p9 = pnand %p3552_p8, %p3546_p5 }
  0x18   :  { %3556 = shalt.err (!%p3553_p9)
}
  0x19   :  { %s3649_s11 = smov 128   ;;  %s3650_s12 = smov 8  }
  0x1a   :  { %59 = dma.hbm_to_vmem [thread:$0]  %s3794_s3, 8192, %s54_s9, [#allocation9], %s3649_s11, %s3649_s11, %s3650_s12  }
  0x1b   :  { %s3651_s15 = smov [#allocation2]   ;;  %s3652_s17 = smov [#allocation7]  }
  0x1c   :  { %s22_s16 = sshll.u32 %s3651_s15, 4  ;;  %s44_s1 = sshll.u32 %s3652_s17, 4  ;;  %s23_s16 = int_to_ptr.vmem [resolvable:$true] %s22_s16  ;;  %s45_s1 = int_to_ptr.vmem [resolvable:$true] %s44_s1 }
  0x1d   :  { %s3565_s18 = scalar_lea.vmem %s23_s16, 1024  ;;  %p3570_p11 = scmp.lt.s32.totalorder %s23_s16, %s23_s16 }
  0x1e   :  { %p3566_p10 = scmp.ne.s32.totalorder %s23_s16, %s3565_s18  ;;  %p3571_p12 = scmp.lt.s32.totalorder %s3565_s18, %s3565_s18 }
  0x20   :  { %p3572_p13 = por %p3571_p12, %p3570_p11 }
  0x22   :  { %p3573_p0 = pnand %p3572_p13, %p3566_p10 }
  0x24   :  { %3576 = shalt.err (!%p3573_p0)
}
  0x25   :  { %25 = dma.hbm_to_vmem [thread:$0]  %s3791_s0, 1024, %s23_s16, [#allocation3]  }
  0x26   :  { %s3585_s21 = scalar_lea.vmem %s45_s1, 64  ;;  %p3590_p2 = scmp.lt.s32.totalorder %s45_s1, %s45_s1 }
  0x27   :  { %p3586_p1 = scmp.ne.s32.totalorder %s45_s1, %s3585_s21  ;;  %p3591_p3 = scmp.lt.s32.totalorder %s3585_s21, %s3585_s21 }
  0x29   :  { %p3592_p4 = por %p3591_p3, %p3590_p2 }
  0x2b   :  { %p3593_p5 = pnand %p3592_p4, %p3586_p1 }
  0x2d   :  { %3596 = shalt.err (!%p3593_p5)
}
  0x2e   :  { %47 = dma.hbm_to_vmem [thread:$0]  %s3793_s2, 64, %s45_s1, [#allocation6]  }
  0x2f   :  { %s3653_s23 = smov [#allocation10]  }
  0x30   :  { %s67_s24 = sshll.u32 %s3653_s23, 4  ;;  %s68_s24 = int_to_ptr.vmem [resolvable:$true] %s67_s24 }
  0x31   :  { %s3605_s25 = scalar_lea.vmem %s68_s24, 2048  ;;  %p3610_p7 = scmp.lt.s32.totalorder %s68_s24, %s68_s24 }
  0x32   :  { %p3606_p6 = scmp.ne.s32.totalorder %s68_s24, %s3605_s25  ;;  %p3611_p8 = scmp.lt.s32.totalorder %s3605_s25, %s3605_s25 }
  0x34   :  { %p3612_p9 = por %p3611_p8, %p3610_p7 }
  0x36   :  { %p3613_p10 = pnand %p3612_p9, %p3606_p6 }
  0x38   :  { %3616 = shalt.err (!%p3613_p10)
}
  0x39   :  { %s3654_s0 = smov 64   ;;  %s3655_s26 = smov 4  }
  0x3a   :  { %73 = dma.hbm_to_vmem [thread:$0]  %s3796_s5, 2048, %s68_s24, [#allocation9], %s3654_s0, %s3654_s0, %s3655_s26  }
  0x3b   :  { %3637 = dma.done.wait [#allocation3], 1024  }
  0x3c   :  { %3638 = vsyncadd [#allocation3], 4294966272 }
  0x3d   :  { %3639 = dma.done.wait [#allocation6], 32064  }
  0x3e   :  { %3640 = vsyncadd [#allocation6], 4294935232 }
  0x3f   :  { %3641 = dma.done.wait [#allocation9], 10240  }
  0x40   :  { %3642 = vsyncadd [#allocation9], 4294957056  ;;  %v3029_v0 = vld [vmem:[#allocation5 + $0xe4] ss:$16 sps:$4 sm:$0xff]   ;;  %v3033_v2 = vld [vmem:[#allocation5 + $0xe0] ss:$16 sps:$4 sm:$0xff]  }
  0x41   :  { %v3031_v1 = vld [vmem:[#allocation5 + $0x2e4] ss:$16 sps:$4 sm:$0xff]   ;;  %1647 = vmatprep.subr.bf16.mxu0 %v3029_v0  ;;  %v3034_v3 = vld [vmem:[#allocation5 + $0x2e0] ss:$16 sps:$4 sm:$0xff]   ;;  %v93_v46 = vld [vmem:[#allocation2 + $0x8] sm:$0xff]  ;;  %vm1630_vm0 = vcmask 850944  }
  0x42   :  { %1688 = vmatprep.subr.bf16.mxu1 %v3031_v1  ;;  %v3035_v4 = vld [vmem:[#allocation5 + $0xc4] ss:$16 sps:$4 sm:$0xff]   ;;  %1648 = vmatpush1.bf16.msra.mxu0 %v3033_v2  ;;  %v3039_v6 = vld [vmem:[#allocation5 + $0xc0] ss:$16 sps:$4 sm:$0xff]   ;;  %v3712_v49 = vpack.c.bf16 %v93_v46, %v93_v46  ;;  %v95_v50 = vld [vmem:[#allocation2 + $0x18] sm:$0xff]  ;;  %vm1634_vm1 = vcmask 1043456  }
  0x43   :  { %1689 = vmatpush1.bf16.msra.mxu1 %v3034_v3  ;;  %v3037_v5 = vld [vmem:[#allocation5 + $0x2c4] ss:$16 sps:$4 sm:$0xff]   ;;  %1649 = vmatprep.subr.bf16.mxu0 %v3035_v4  ;;  %v3040_v7 = vld [vmem:[#allocation5 + $0x2c0] ss:$16 sps:$4 sm:$0xff]   ;;  %v3714_v52 = vpack.c.bf16 %v95_v50, %v95_v50  ;;  %s3656_s30 = smov [#allocation11]  }
  0x44   :  { %1690 = vmatprep.subr.bf16.mxu1 %v3037_v5  ;;  %v3041_v8 = vld [vmem:[#allocation5 + $0xa4] ss:$16 sps:$4 sm:$0xff]   ;;  %v3045_v10 = vld [vmem:[#allocation5 + $0xa0] ss:$16 sps:$4 sm:$0xff]   ;;  %1679 = vmatprep.mubr.bf16.mxu0 %v3712_v49  ;;  %s2647_s8 = sshll.u32 %s3656_s30, 4  ;;  %s2648_s8 = int_to_ptr.vmem [resolvable:$true] %s2647_s8 }
  0x45   :  { %v3043_v9 = vld [vmem:[#allocation5 + $0x2a4] ss:$16 sps:$4 sm:$0xff]   ;;  %v3046_v11 = vld [vmem:[#allocation5 + $0x2a0] ss:$16 sps:$4 sm:$0xff]   ;;  %1720 = vmatprep.mubr.bf16.mxu1 %v3714_v52  ;;  %s3617_s9 = scalar_lea.vmem %s2648_s8, 128  ;;  %p3622_p12 = scmp.lt.s32.totalorder %s2648_s8, %s2648_s8 }
  0x46   :  { %1650 = vmatpush1.bf16.msra.mxu0 %v3039_v6  ;;  %v3047_v12 = vld [vmem:[#allocation5 + $0x84] ss:$16 sps:$4 sm:$0xff]   ;;  %v3051_v14 = vld [vmem:[#allocation5 + $0x80] ss:$16 sps:$4 sm:$0xff]   ;;  %p3618_p11 = scmp.ne.s32.totalorder %s2648_s8, %s3617_s9  ;;  %p3623_p13 = scmp.lt.s32.totalorder %s3617_s9, %s3617_s9 }
  0x47   :  { %1691 = vmatpush1.bf16.msra.mxu1 %v3040_v7  ;;  %1651 = vmatprep.subr.bf16.mxu0 %v3041_v8  ;;  %v3049_v13 = vld [vmem:[#allocation5 + $0x284] ss:$16 sps:$4 sm:$0xff]   ;;  %v3052_v15 = vld [vmem:[#allocation5 + $0x280] ss:$16 sps:$4 sm:$0xff]  }
  0x48   :  { %1692 = vmatprep.subr.bf16.mxu1 %v3043_v9  ;;  %v3053_v16 = vld [vmem:[#allocation5 + $0x64] ss:$16 sps:$4 sm:$0xff]   ;;  %v3057_v18 = vld [vmem:[#allocation5 + $0x60] ss:$16 sps:$4 sm:$0xff]   ;;  %p3624_p0 = por %p3623_p13, %p3622_p12 }
  0x49   :  { %v3055_v17 = vld [vmem:[#allocation5 + $0x264] ss:$16 sps:$4 sm:$0xff]   ;;  %v3058_v19 = vld [vmem:[#allocation5 + $0x260] ss:$16 sps:$4 sm:$0xff]  }
  0x4a   :  { %1652 = vmatpush1.bf16.msra.mxu0 %v3045_v10  ;;  %v3059_v20 = vld [vmem:[#allocation5 + $0x44] ss:$16 sps:$4 sm:$0xff]   ;;  %v3063_v22 = vld [vmem:[#allocation5 + $0x40] ss:$16 sps:$4 sm:$0xff]   ;;  %p3625_p1 = pnand %p3624_p0, %p3618_p11 }
  0x4b   :  { %1693 = vmatpush1.bf16.msra.mxu1 %v3046_v11  ;;  %1653 = vmatprep.subr.bf16.mxu0 %v3047_v12  ;;  %v3061_v21 = vld [vmem:[#allocation5 + $0x244] ss:$16 sps:$4 sm:$0xff]   ;;  %v3064_v23 = vld [vmem:[#allocation5 + $0x240] ss:$16 sps:$4 sm:$0xff]  }
  0x4c   :  { %1694 = vmatprep.subr.bf16.mxu1 %v3049_v13  ;;  %v3065_v24 = vld [vmem:[#allocation5 + $0x24] ss:$16 sps:$4 sm:$0xff]   ;;  %v3069_v26 = vld [vmem:[#allocation5 + $0x20] ss:$16 sps:$4 sm:$0xff]  }
  0x4d   :  { %v3067_v25 = vld [vmem:[#allocation5 + $0x224] ss:$16 sps:$4 sm:$0xff]   ;;  %v3070_v27 = vld [vmem:[#allocation5 + $0x220] ss:$16 sps:$4 sm:$0xff]  }
  0x4e   :  { %1654 = vmatpush1.bf16.msra.mxu0 %v3051_v14  ;;  %v3071_v28 = vld [vmem:[#allocation5 + $0x4] ss:$16 sps:$4 sm:$0xff]   ;;  %v3075_v30 = vld [vmem:[#allocation5] ss:$16 sps:$4 sm:$0xff]  }
  0x4f   :  { %1695 = vmatpush1.bf16.msra.mxu1 %v3052_v15  ;;  %1655 = vmatprep.subr.bf16.mxu0 %v3053_v16  ;;  %v3073_v29 = vld [vmem:[#allocation5 + $0x204] ss:$16 sps:$4 sm:$0xff]   ;;  %v3076_v31 = vld [vmem:[#allocation5 + $0x200] ss:$16 sps:$4 sm:$0xff]  }
  0x50   :  { %1696 = vmatprep.subr.bf16.mxu1 %v3055_v17  ;;  %v3077_v32 = vld [vmem:[#allocation5 + $0x1e4] ss:$16 sps:$4 sm:$0xff]   ;;  %v3081_v34 = vld [vmem:[#allocation5 + $0x1e0] ss:$16 sps:$4 sm:$0xff]  }
  0x51   :  { %v3079_v33 = vld [vmem:[#allocation5 + $0x3e4] ss:$16 sps:$4 sm:$0xff]   ;;  %v3082_v35 = vld [vmem:[#allocation5 + $0x3e0] ss:$16 sps:$4 sm:$0xff]  }
  0x52   :  { %1656 = vmatpush1.bf16.msra.mxu0 %v3057_v18  ;;  %v3083_v36 = vld [vmem:[#allocation5 + $0x1c4] ss:$16 sps:$4 sm:$0xff]   ;;  %v3087_v38 = vld [vmem:[#allocation5 + $0x1c0] ss:$16 sps:$4 sm:$0xff]  }
  0x53   :  { %1697 = vmatpush1.bf16.msra.mxu1 %v3058_v19  ;;  %1657 = vmatprep.subr.bf16.mxu0 %v3059_v20  ;;  %v3085_v37 = vld [vmem:[#allocation5 + $0x3c4] ss:$16 sps:$4 sm:$0xff]   ;;  %v3088_v39 = vld [vmem:[#allocation5 + $0x3c0] ss:$16 sps:$4 sm:$0xff]  }
  0x54   :  { %1698 = vmatprep.subr.bf16.mxu1 %v3061_v21  ;;  %v3089_v40 = vld [vmem:[#allocation5 + $0x1a4] ss:$16 sps:$4 sm:$0xff]   ;;  %v3093_v42 = vld [vmem:[#allocation5 + $0x1a0] ss:$16 sps:$4 sm:$0xff]  }
  0x55   :  { %v3091_v41 = vld [vmem:[#allocation5 + $0x3a4] ss:$16 sps:$4 sm:$0xff]   ;;  %v3094_v43 = vld [vmem:[#allocation5 + $0x3a0] ss:$16 sps:$4 sm:$0xff]  }
  0x56   :  { %1658 = vmatpush1.bf16.msra.mxu0 %v3063_v22  ;;  %v3095_v44 = vld [vmem:[#allocation5 + $0x184] ss:$16 sps:$4 sm:$0xff]   ;;  %v3099_v47 = vld [vmem:[#allocation5 + $0x180] ss:$16 sps:$4 sm:$0xff]  }
  0x57   :  { %1699 = vmatpush1.bf16.msra.mxu1 %v3064_v23  ;;  %1659 = vmatprep.subr.bf16.mxu0 %v3065_v24  ;;  %v3097_v45 = vld [vmem:[#allocation5 + $0x384] ss:$16 sps:$4 sm:$0xff]   ;;  %v3100_v48 = vld [vmem:[#allocation5 + $0x380] ss:$16 sps:$4 sm:$0xff]  }
  0x58   :  { %1700 = vmatprep.subr.bf16.mxu1 %v3067_v25  ;;  %v3101_v51 = vld [vmem:[#allocation5 + $0x164] ss:$16 sps:$4 sm:$0xff]   ;;  %v3105_v54 = vld [vmem:[#allocation5 + $0x160] ss:$16 sps:$4 sm:$0xff]  }
  0x59   :  { %v3103_v53 = vld [vmem:[#allocation5 + $0x364] ss:$16 sps:$4 sm:$0xff]   ;;  %v3106_v55 = vld [vmem:[#allocation5 + $0x360] ss:$16 sps:$4 sm:$0xff]  }
  0x5a   :  { %1660 = vmatpush1.bf16.msra.mxu0 %v3069_v26  ;;  %v3107_v56 = vld [vmem:[#allocation5 + $0x144] ss:$16 sps:$4 sm:$0xff]   ;;  %v3111_v58 = vld [vmem:[#allocation5 + $0x140] ss:$16 sps:$4 sm:$0xff]  }
  0x5b   :  { %1701 = vmatpush1.bf16.msra.mxu1 %v3070_v27  ;;  %1661 = vmatprep.subr.bf16.mxu0 %v3071_v28  ;;  %v3109_v57 = vld [vmem:[#allocation5 + $0x344] ss:$16 sps:$4 sm:$0xff]   ;;  %v3112_v59 = vld [vmem:[#allocation5 + $0x340] ss:$16 sps:$4 sm:$0xff]  }
  0x5c   :  { %1702 = vmatprep.subr.bf16.mxu1 %v3073_v29  ;;  %v3113_v60 = vld [vmem:[#allocation5 + $0x124] ss:$16 sps:$4 sm:$0xff]   ;;  %v3117_v62 = vld [vmem:[#allocation5 + $0x120] ss:$16 sps:$4 sm:$0xff]  }
  0x5d   :  { %v3115_v61 = vld [vmem:[#allocation5 + $0x324] ss:$16 sps:$4 sm:$0xff]   ;;  %v3118_v63 = vld [vmem:[#allocation5 + $0x320] ss:$16 sps:$4 sm:$0xff]  }
  0x5e   :  { %1662 = vmatpush1.bf16.msra.mxu0 %v3075_v30  ;;  %v3119_v0 = vld [vmem:[#allocation5 + $0x104] ss:$16 sps:$4 sm:$0xff]   ;;  %v3123_v2 = vld [vmem:[#allocation5 + $0x100] ss:$16 sps:$4 sm:$0xff]   ;;  %v99_v30 = vld [vmem:[#allocation2 + $0x38] sm:$0xff] }
  0x5f   :  { %1703 = vmatpush1.bf16.msra.mxu1 %v3076_v31  ;;  %1663 = vmatprep.subr.bf16.mxu0 %v3077_v32  ;;  %v3121_v1 = vld [vmem:[#allocation5 + $0x304] ss:$16 sps:$4 sm:$0xff]   ;;  %v3124_v3 = vld [vmem:[#allocation5 + $0x300] ss:$16 sps:$4 sm:$0xff]  }
  0x60   :  { %1704 = vmatprep.subr.bf16.mxu1 %v3079_v33  ;;  %v92_v4 = vld [vmem:[#allocation2] sm:$0xff]  ;;  %v94_v5 = vld [vmem:[#allocation2 + $0x10] sm:$0xff] }
  0x61   :  { %v3127_v6 = vld [vmem:[#allocation5 + $0x4e4] ss:$16 sps:$4 sm:$0xff]   ;;  %v3718_v8 = vpack.c.bf16 %v92_v4, %v92_v4  ;;  %v3720_v9 = vpack.c.bf16 %v94_v5, %v94_v5  ;;  %v3125_v10 = vld [vmem:[#allocation5 + $0x4e0] ss:$16 sps:$4 sm:$0xff]  }
  0x62   :  { %1664 = vmatpush2.bf16.msra.mxu0 %v3081_v34  ;;  %v3130_v7 = vld [vmem:[#allocation5 + $0x6e4] ss:$16 sps:$4 sm:$0xff]   ;;  %v3128_v11 = vld [vmem:[#allocation5 + $0x6e0] ss:$16 sps:$4 sm:$0xff]   ;;  %v3724_v34 = vpack.c.bf16 %v99_v30, %v99_v30  ;;  %v3234_v30 = vld [vmem:[#allocation5 + $0x8c] ss:$16 sps:$4 sm:$0xff]  }
  0x63   :  { %1705 = vmatpush2.bf16.msra.mxu1 %v3082_v35  ;;  %1665 = vmatprep.subr.bf16.mxu0 %v3083_v36  ;;  %v3133_v12 = vld [vmem:[#allocation5 + $0x4c4] ss:$16 sps:$4 sm:$0xff]   ;;  %v3131_v14 = vld [vmem:[#allocation5 + $0x4c0] ss:$16 sps:$4 sm:$0xff]   ;;  %v97_v36 = vld [vmem:[#allocation2 + $0x28] sm:$0xff] }
  0x64   :  { %1706 = vmatprep.subr.bf16.mxu1 %v3085_v37  ;;  %v3136_v13 = vld [vmem:[#allocation5 + $0x6c4] ss:$16 sps:$4 sm:$0xff]   ;;  %v3134_v15 = vld [vmem:[#allocation5 + $0x6c0] ss:$16 sps:$4 sm:$0xff]  }
  0x65   :  { %v3139_v16 = vld [vmem:[#allocation5 + $0x4a4] ss:$16 sps:$4 sm:$0xff]   ;;  %v3137_v18 = vld [vmem:[#allocation5 + $0x4a0] ss:$16 sps:$4 sm:$0xff]  }
  0x66   :  { %1666 = vmatpush2.bf16.msra.mxu0 %v3087_v38  ;;  %v3142_v17 = vld [vmem:[#allocation5 + $0x6a4] ss:$16 sps:$4 sm:$0xff]   ;;  %v3140_v19 = vld [vmem:[#allocation5 + $0x6a0] ss:$16 sps:$4 sm:$0xff]   ;;  %v3728_v38 = vpack.c.bf16 %v97_v36, %v97_v36  ;;  %v3238_v36 = vld [vmem:[#allocation5 + $0x68] ss:$16 sps:$4 sm:$0xff]  }
  0x67   :  { %1707 = vmatpush2.bf16.msra.mxu1 %v3088_v39  ;;  %1667 = vmatprep.subr.bf16.mxu0 %v3089_v40  ;;  %v3145_v20 = vld [vmem:[#allocation5 + $0x484] ss:$16 sps:$4 sm:$0xff]   ;;  %v3143_v22 = vld [vmem:[#allocation5 + $0x480] ss:$16 sps:$4 sm:$0xff]  }
  0x68   :  { %1708 = vmatprep.subr.bf16.mxu1 %v3091_v41  ;;  %v3148_v21 = vld [vmem:[#allocation5 + $0x684] ss:$16 sps:$4 sm:$0xff]   ;;  %v3146_v23 = vld [vmem:[#allocation5 + $0x680] ss:$16 sps:$4 sm:$0xff]  }
  0x69   :  { %v3151_v24 = vld [vmem:[#allocation5 + $0x464] ss:$16 sps:$4 sm:$0xff]   ;;  %v3149_v26 = vld [vmem:[#allocation5 + $0x460] ss:$16 sps:$4 sm:$0xff]  }
  0x6a   :  { %1668 = vmatpush2.bf16.msra.mxu0 %v3093_v42  ;;  %v3154_v25 = vld [vmem:[#allocation5 + $0x664] ss:$16 sps:$4 sm:$0xff]   ;;  %v3152_v27 = vld [vmem:[#allocation5 + $0x660] ss:$16 sps:$4 sm:$0xff]  }
  0x6b   :  { %1709 = vmatpush2.bf16.msra.mxu1 %v3094_v43  ;;  %1669 = vmatprep.subr.bf16.mxu0 %v3095_v44  ;;  %v3157_v28 = vld [vmem:[#allocation5 + $0x444] ss:$16 sps:$4 sm:$0xff]   ;;  %v3155_v31 = vld [vmem:[#allocation5 + $0x440] ss:$16 sps:$4 sm:$0xff]  }
  0x6c   :  { %1710 = vmatprep.subr.bf16.mxu1 %v3097_v45  ;;  %v3160_v29 = vld [vmem:[#allocation5 + $0x644] ss:$16 sps:$4 sm:$0xff]   ;;  %v3158_v32 = vld [vmem:[#allocation5 + $0x640] ss:$16 sps:$4 sm:$0xff]  }
  0x6d   :  { %v3163_v33 = vld [vmem:[#allocation5 + $0x424] ss:$16 sps:$4 sm:$0xff]   ;;  %v3161_v37 = vld [vmem:[#allocation5 + $0x420] ss:$16 sps:$4 sm:$0xff]  }
  0x6e   :  { %1670 = vmatpush2.bf16.msra.mxu0 %v3099_v47  ;;  %v3166_v35 = vld [vmem:[#allocation5 + $0x624] ss:$16 sps:$4 sm:$0xff]   ;;  %v3164_v39 = vld [vmem:[#allocation5 + $0x620] ss:$16 sps:$4 sm:$0xff]  }
  0x6f   :  { %1711 = vmatpush2.bf16.msra.mxu1 %v3100_v48  ;;  %1671 = vmatprep.subr.bf16.mxu0 %v3101_v51  ;;  %v3169_v40 = vld [vmem:[#allocation5 + $0x404] ss:$16 sps:$4 sm:$0xff]   ;;  %v3167_v43 = vld [vmem:[#allocation5 + $0x400] ss:$16 sps:$4 sm:$0xff]  }
  0x70   :  { %1712 = vmatprep.subr.bf16.mxu1 %v3103_v53  ;;  %v3172_v41 = vld [vmem:[#allocation5 + $0x604] ss:$16 sps:$4 sm:$0xff]   ;;  %v3170_v44 = vld [vmem:[#allocation5 + $0x600] ss:$16 sps:$4 sm:$0xff]  }
  0x71   :  { %v356_v42 = vld [vmem:[#allocation5 + $0x7c0] sm:$0xff] }
  0x72   :  { %1672 = vmatpush2.bf16.msra.mxu0 %v3105_v54  ;;  %v3175_v45 = vld [vmem:[#allocation5 + $0x5e4] ss:$16 sps:$4 sm:$0xff]   ;;  %v2907_v46 = vcombine.high %v356_v42, %v356_v42  ;;  %v2906_v47 = vcombine.low %v356_v42, %v356_v42  ;;  %v3173_v48 = vld [vmem:[#allocation5 + $0x5e0] ss:$16 sps:$4 sm:$0xff]   ;;  %v3252_v42 = vld [vmem:[#allocation5 + $0x2c] ss:$16 sps:$4 sm:$0xff]  }
  0x73   :  { %1713 = vmatpush2.bf16.msra.mxu1 %v3106_v55  ;;  %1673 = vmatprep.subr.bf16.mxu0 %v3107_v56  ;;  %v3180_v51 = vld [vmem:[#allocation5 + $0x5c4] ss:$16 sps:$4 sm:$0xff]   ;;  %v3178_v54 = vld [vmem:[#allocation5 + $0x5c0] ss:$16 sps:$4 sm:$0xff]  }
  0x74   :  { %1714 = vmatprep.subr.bf16.mxu1 %v3109_v57  ;;  %v1636_v50 = vsel %vm1634_vm1, %v2906_v47, 0  ;;  %v3183_v53 = vld [vmem:[#allocation5 + $0x7a4] ss:$16 sps:$4 sm:$0xff]   ;;  %v3181_v55 = vld [vmem:[#allocation5 + $0x7a0] ss:$16 sps:$4 sm:$0xff]  }
  0x75   :  { %v3186_v56 = vld [vmem:[#allocation5 + $0x5a4] ss:$16 sps:$4 sm:$0xff]   ;;  %v3261_v47 = vld [vmem:[#allocation5 + $0x22c] ss:$16 sps:$4 sm:$0xff]  }
  0x76   :  { %1674 = vmatpush2.bf16.msra.mxu0 %v3111_v58  ;;  %v3189_v57 = vld [vmem:[#allocation5 + $0x784] ss:$16 sps:$4 sm:$0xff]   ;;  %v3184_v58 = vld [vmem:[#allocation5 + $0x5a0] ss:$16 sps:$4 sm:$0xff]  }
  0x77   :  { %1715 = vmatpush2.bf16.msra.mxu1 %v3112_v59  ;;  %1675 = vmatprep.subr.bf16.mxu0 %v3113_v60  ;;  %v3187_v59 = vld [vmem:[#allocation5 + $0x780] ss:$16 sps:$4 sm:$0xff]   ;;  %v3192_v60 = vld [vmem:[#allocation5 + $0x584] ss:$16 sps:$4 sm:$0xff]  }
  0x78   :  { %1716 = vmatprep.subr.bf16.mxu1 %v3115_v61  ;;  %v3195_v61 = vld [vmem:[#allocation5 + $0x764] ss:$16 sps:$4 sm:$0xff]  }
  0x79   :  { %v3204_v4 = vld [vmem:[#allocation5 + $0x544] ss:$16 sps:$4 sm:$0xff]  }
  0x7a   :  { %1676 = vmatpush2.bf16.msra.mxu0 %v3117_v62  ;;  %v3190_v62 = vld [vmem:[#allocation5 + $0x580] ss:$16 sps:$4 sm:$0xff]   ;;  %v3207_v5 = vld [vmem:[#allocation5 + $0x724] ss:$16 sps:$4 sm:$0xff]  }
  0x7b   :  { %1717 = vmatpush2.bf16.msra.mxu1 %v3118_v63  ;;  %1677 = vmatprep.subr.bf16.mxu0 %v3119_v0  ;;  %v3193_v63 = vld [vmem:[#allocation5 + $0x760] ss:$16 sps:$4 sm:$0xff]   ;;  %v3198_v0 = vld [vmem:[#allocation5 + $0x564] ss:$16 sps:$4 sm:$0xff]  }
  0x7c   :  { %1718 = vmatprep.subr.bf16.mxu1 %v3121_v1  ;;  %v3201_v1 = vld [vmem:[#allocation5 + $0x744] ss:$16 sps:$4 sm:$0xff]  }
  0x7e   :  { %1678 = vmatpush2.bf16.msra.mxu0 %v3123_v2  ;;  %v3196_v2 = vld [vmem:[#allocation5 + $0x560] ss:$16 sps:$4 sm:$0xff]  }
  0x7f   :  { %1719 = vmatpush2.bf16.msra.mxu1 %v3124_v3  ;;  %1729 = vmatprep.subr.bf16.mxu0 %v3127_v6  ;;  %v3199_v3 = vld [vmem:[#allocation5 + $0x740] ss:$16 sps:$4 sm:$0xff]  }
  0x80   :  { %1770 = vmatprep.subr.bf16.mxu1 %v3130_v7  ;;  %v3202_v6 = vld [vmem:[#allocation5 + $0x540] ss:$16 sps:$4 sm:$0xff]  }
  0x81   :  { %1680 = vmatmul.mubr.bf16.vlgmr.msra.gmra.mxu0 %v3718_v8  ;;  %v3205_v7 = vld [vmem:[#allocation5 + $0x720] ss:$16 sps:$4 sm:$0xff]  }
  0x82   :  { %1721 = vmatmul.mubr.bf16.vlgmr.msra.gmra.mxu1 %v3720_v9  ;;  %1730 = vmatpush1.bf16.msra.mxu0 %v3125_v10  ;;  %v3210_v10 = vld [vmem:[#allocation5 + $0x524] ss:$16 sps:$4 sm:$0xff]  }
  0x83   :  { %1771 = vmatpush1.bf16.msra.mxu1 %v3128_v11  ;;  %1731 = vmatprep.subr.bf16.mxu0 %v3133_v12  ;;  %v3213_v11 = vld [vmem:[#allocation5 + $0x704] ss:$16 sps:$4 sm:$0xff]   ;;  %v3208_v12 = vld [vmem:[#allocation5 + $0x520] ss:$16 sps:$4 sm:$0xff]  }
  0x84   :  { %1772 = vmatprep.subr.bf16.mxu1 %v3136_v13  ;;  %2911 = vmatprep.mubr.msk.bf16.mxu1 %vm1630_vm0, %v3724_v34  ;;  %v3211_v13 = vld [vmem:[#allocation5 + $0x700] ss:$16 sps:$4 sm:$0xff]  }
  0x85   :  { %1761 = vmatprep.mubr.bf16.mxu0 %v3728_v38 }
  0x86   :  { %1732 = vmatpush1.bf16.msra.mxu0 %v3131_v14  ;;  %v98_v14 = vld [vmem:[#allocation2 + $0x30] sm:$0xff] }
  0x87   :  { %1773 = vmatpush1.bf16.msra.mxu1 %v3134_v15  ;;  %1733 = vmatprep.subr.bf16.mxu0 %v3139_v16  ;;  %v3216_v15 = vld [vmem:[#allocation5 + $0x504] ss:$16 sps:$4 sm:$0xff]   ;;  %v3219_v16 = vld [vmem:[#allocation5 + $0xec] ss:$16 sps:$4 sm:$0xff]  }
  0x88   :  { %1774 = vmatprep.subr.bf16.mxu1 %v3142_v17  ;;  %v3214_v17 = vld [vmem:[#allocation5 + $0x500] ss:$16 sps:$4 sm:$0xff]  }
  0x8a   :  { %1734 = vmatpush1.bf16.msra.mxu0 %v3137_v18  ;;  %v3733_v18 = vpack.c.bf16 %v98_v14, %v98_v14  ;;  %v3300_v14 = vld [vmem:[#allocation5 + $0x12c] ss:$16 sps:$4 sm:$0xff]  }
  0x8b   :  { %1775 = vmatpush1.bf16.msra.mxu1 %v3140_v19  ;;  %1735 = vmatprep.subr.bf16.mxu0 %v3145_v20  ;;  %v3217_v19 = vld [vmem:[#allocation5 + $0xe8] ss:$16 sps:$4 sm:$0xff]   ;;  %v96_v20 = vld [vmem:[#allocation2 + $0x20] sm:$0xff] }
  0x8c   :  { %1776 = vmatprep.subr.bf16.mxu1 %v3148_v21  ;;  %v3222_v21 = vld [vmem:[#allocation5 + $0xcc] ss:$16 sps:$4 sm:$0xff]  }
  0x8e   :  { %1736 = vmatpush1.bf16.msra.mxu0 %v3143_v22  ;;  %v3225_v22 = vld [vmem:[#allocation5 + $0x2ec] ss:$16 sps:$4 sm:$0xff]  }
  0x8f   :  { %1777 = vmatpush1.bf16.msra.mxu1 %v3146_v23  ;;  %1737 = vmatprep.subr.bf16.mxu0 %v3151_v24  ;;  %v3736_v23 = vpack.c.bf16 %v96_v20, %v96_v20  ;;  %v3220_v24 = vld [vmem:[#allocation5 + $0xc8] ss:$16 sps:$4 sm:$0xff]   ;;  %v3309_v20 = vld [vmem:[#allocation5 + $0x32c] ss:$16 sps:$4 sm:$0xff]  }
  0x90   :  { %1778 = vmatprep.subr.bf16.mxu1 %v3154_v25  ;;  %v3223_v25 = vld [vmem:[#allocation5 + $0x2e8] ss:$16 sps:$4 sm:$0xff]  }
  0x92   :  { %1738 = vmatpush1.bf16.msra.mxu0 %v3149_v26  ;;  %v3228_v26 = vld [vmem:[#allocation5 + $0xac] ss:$16 sps:$4 sm:$0xff]  }
  0x93   :  { %1779 = vmatpush1.bf16.msra.mxu1 %v3152_v27  ;;  %1739 = vmatprep.subr.bf16.mxu0 %v3157_v28  ;;  %v3231_v27 = vld [vmem:[#allocation5 + $0x2cc] ss:$16 sps:$4 sm:$0xff]   ;;  %v3226_v28 = vld [vmem:[#allocation5 + $0xa8] ss:$16 sps:$4 sm:$0xff]  }
  0x94   :  { %1780 = vmatprep.subr.bf16.mxu1 %v3160_v29  ;;  %v3229_v29 = vld [vmem:[#allocation5 + $0x2c8] ss:$16 sps:$4 sm:$0xff]  }
  0x96   :  { %1740 = vmatpush1.bf16.msra.mxu0 %v3155_v31  ;;  %v3237_v31 = vld [vmem:[#allocation5 + $0x2ac] ss:$16 sps:$4 sm:$0xff]  }
  0x97   :  { %1781 = vmatpush1.bf16.msra.mxu1 %v3158_v32  ;;  %1741 = vmatprep.subr.bf16.mxu0 %v3163_v33  ;;  %v3232_v32 = vld [vmem:[#allocation5 + $0x88] ss:$16 sps:$4 sm:$0xff]  }
  0x98   :  { %1782 = vmatprep.subr.bf16.mxu1 %v3166_v35  ;;  %v3235_v33 = vld [vmem:[#allocation5 + $0x2a8] ss:$16 sps:$4 sm:$0xff]   ;;  %v3240_v35 = vld [vmem:[#allocation5 + $0x6c] ss:$16 sps:$4 sm:$0xff]  }
  0x9a   :  { %1742 = vmatpush1.bf16.msra.mxu0 %v3161_v37  ;;  %v3241_v37 = vld [vmem:[#allocation5 + $0x288] ss:$16 sps:$4 sm:$0xff]  }
  0x9b   :  { %1783 = vmatpush1.bf16.msra.mxu1 %v3164_v39  ;;  %1743 = vmatprep.subr.bf16.mxu0 %v3169_v40  ;;  %v3246_v39 = vld [vmem:[#allocation5 + $0x4c] ss:$16 sps:$4 sm:$0xff]  }
  0x9c   :  { %1784 = vmatprep.subr.bf16.mxu1 %v3172_v41  ;;  %v3249_v40 = vld [vmem:[#allocation5 + $0x26c] ss:$16 sps:$4 sm:$0xff]   ;;  %v3244_v41 = vld [vmem:[#allocation5 + $0x48] ss:$16 sps:$4 sm:$0xff]  }
  0x9e   :  { %1744 = vmatpush1.bf16.msra.mxu0 %v3167_v43  ;;  %v3255_v43 = vld [vmem:[#allocation5 + $0x24c] ss:$16 sps:$4 sm:$0xff]  }
  0x9f   :  { %1785 = vmatpush1.bf16.msra.mxu1 %v3170_v44  ;;  %1745 = vmatprep.subr.bf16.mxu0 %v3175_v45  ;;  %v3250_v44 = vld [vmem:[#allocation5 + $0x28] ss:$16 sps:$4 sm:$0xff]  }
  0xa0   :  { %2910 = vmatprep.subr.msk.bf16.mxu1 %vm1634_vm1, %v2907_v46  ;;  %v3253_v45 = vld [vmem:[#allocation5 + $0x248] ss:$16 sps:$4 sm:$0xff]   ;;  %v3258_v46 = vld [vmem:[#allocation5 + $0xc] ss:$16 sps:$4 sm:$0xff]  }
  0xa2   :  { %1746 = vmatpush2.bf16.msra.mxu0 %v3173_v48  ;;  %v3256_v48 = vld [vmem:[#allocation5 + $0x8] ss:$16 sps:$4 sm:$0xff]  }
  0xa3   :  { %1789 = vmatpush2.bf16.msra.mxu1 %v1636_v50  ;;  %1747 = vmatprep.subr.bf16.mxu0 %v3180_v51  ;;  %v3259_v50 = vld [vmem:[#allocation5 + $0x228] ss:$16 sps:$4 sm:$0xff]   ;;  %v3264_v51 = vld [vmem:[#allocation5 + $0x1ec] ss:$16 sps:$4 sm:$0xff]  }
  0xa4   :  { %1790 = vmatprep.subr.bf16.mxu1 %v3183_v53  ;;  %v3267_v53 = vld [vmem:[#allocation5 + $0x20c] ss:$16 sps:$4 sm:$0xff]  }
  0xa6   :  { %1748 = vmatpush2.bf16.msra.mxu0 %v3178_v54  ;;  %v3262_v54 = vld [vmem:[#allocation5 + $0x1e8] ss:$16 sps:$4 sm:$0xff]  }
  0xa7   :  { %1791 = vmatpush2.bf16.msra.mxu1 %v3181_v55  ;;  %1749 = vmatprep.subr.bf16.mxu0 %v3186_v56  ;;  %v3265_v55 = vld [vmem:[#allocation5 + $0x208] ss:$16 sps:$4 sm:$0xff]   ;;  %v3270_v56 = vld [vmem:[#allocation5 + $0x1cc] ss:$16 sps:$4 sm:$0xff]  }
  0xa8   :  { %1792 = vmatprep.subr.bf16.mxu1 %v3189_v57  ;;  %v3273_v57 = vld [vmem:[#allocation5 + $0x3ec] ss:$16 sps:$4 sm:$0xff]  }
  0xaa   :  { %1750 = vmatpush2.bf16.msra.mxu0 %v3184_v58  ;;  %v3268_v58 = vld [vmem:[#allocation5 + $0x1c8] ss:$16 sps:$4 sm:$0xff]  }
  0xab   :  { %1793 = vmatpush2.bf16.msra.mxu1 %v3187_v59  ;;  %1751 = vmatprep.subr.bf16.mxu0 %v3192_v60  ;;  %v3271_v59 = vld [vmem:[#allocation5 + $0x3e8] ss:$16 sps:$4 sm:$0xff]   ;;  %v3276_v60 = vld [vmem:[#allocation5 + $0x1ac] ss:$16 sps:$4 sm:$0xff]  }
  0xac   :  { %1794 = vmatprep.subr.bf16.mxu1 %v3195_v61  ;;  %v3279_v61 = vld [vmem:[#allocation5 + $0x3cc] ss:$16 sps:$4 sm:$0xff]  }
  0xae   :  { %1752 = vmatpush2.bf16.msra.mxu0 %v3190_v62  ;;  %v3274_v62 = vld [vmem:[#allocation5 + $0x1a8] ss:$16 sps:$4 sm:$0xff]  }
  0xaf   :  { %1795 = vmatpush2.bf16.msra.mxu1 %v3193_v63  ;;  %1753 = vmatprep.subr.bf16.mxu0 %v3198_v0  ;;  %v3277_v63 = vld [vmem:[#allocation5 + $0x3c8] ss:$16 sps:$4 sm:$0xff]   ;;  %v3282_v0 = vld [vmem:[#allocation5 + $0x18c] ss:$16 sps:$4 sm:$0xff]  }
  0xb0   :  { %1796 = vmatprep.subr.bf16.mxu1 %v3201_v1  ;;  %v3285_v1 = vld [vmem:[#allocation5 + $0x3ac] ss:$16 sps:$4 sm:$0xff]  }
  0xb2   :  { %1754 = vmatpush2.bf16.msra.mxu0 %v3196_v2  ;;  %v3280_v2 = vld [vmem:[#allocation5 + $0x188] ss:$16 sps:$4 sm:$0xff]  }
  0xb3   :  { %1797 = vmatpush2.bf16.msra.mxu1 %v3199_v3  ;;  %1755 = vmatprep.subr.bf16.mxu0 %v3204_v4  ;;  %v3283_v3 = vld [vmem:[#allocation5 + $0x3a8] ss:$16 sps:$4 sm:$0xff]   ;;  %v3288_v4 = vld [vmem:[#allocation5 + $0x16c] ss:$16 sps:$4 sm:$0xff]  }
  0xb4   :  { %1798 = vmatprep.subr.bf16.mxu1 %v3207_v5  ;;  %v3291_v5 = vld [vmem:[#allocation5 + $0x38c] ss:$16 sps:$4 sm:$0xff]  }
  0xb6   :  { %1756 = vmatpush2.bf16.msra.mxu0 %v3202_v6  ;;  %v3286_v6 = vld [vmem:[#allocation5 + $0x168] ss:$16 sps:$4 sm:$0xff]  }
  0xb7   :  { %1799 = vmatpush2.bf16.msra.mxu1 %v3205_v7  ;;  %1757 = vmatprep.subr.bf16.mxu0 %v3210_v10  ;;  %v3289_v7 = vld [vmem:[#allocation5 + $0x388] ss:$16 sps:$4 sm:$0xff]   ;;  %v3294_v10 = vld [vmem:[#allocation5 + $0x14c] ss:$16 sps:$4 sm:$0xff]  }
  0xb8   :  { %1800 = vmatprep.subr.bf16.mxu1 %v3213_v11  ;;  %v3297_v11 = vld [vmem:[#allocation5 + $0x36c] ss:$16 sps:$4 sm:$0xff]  }
  0xba   :  { %1758 = vmatpush2.bf16.msra.mxu0 %v3208_v12  ;;  %v3292_v12 = vld [vmem:[#allocation5 + $0x148] ss:$16 sps:$4 sm:$0xff]  }
  0xbb   :  { %1801 = vmatpush2.bf16.msra.mxu1 %v3211_v13  ;;  %1759 = vmatprep.subr.bf16.mxu0 %v3216_v15  ;;  %v3295_v13 = vld [vmem:[#allocation5 + $0x368] ss:$16 sps:$4 sm:$0xff]   ;;  %v3303_v15 = vld [vmem:[#allocation5 + $0x34c] ss:$16 sps:$4 sm:$0xff]  }
  0xbc   :  { %1811 = vmatprep.subr.bf16.mxu1 %v3219_v16  ;;  %v3298_v16 = vld [vmem:[#allocation5 + $0x128] ss:$16 sps:$4 sm:$0xff]  }
  0xbe   :  { %1803 = vmatmul.mubr.bf16.vlgmr.msra.gmra.mxu1 %v3733_v18  ;;  %1760 = vmatpush2.bf16.msra.mxu0 %v3214_v17  ;;  %v3301_v17 = vld [vmem:[#allocation5 + $0x348] ss:$16 sps:$4 sm:$0xff]  }
  0xbf   :  { %1812 = vmatpush1.bf16.msra.mxu1 %v3217_v19  ;;  %1852 = vmatprep.subr.bf16.mxu0 %v3225_v22  ;;  %v3306_v19 = vld [vmem:[#allocation5 + $0x10c] ss:$16 sps:$4 sm:$0xff]   ;;  %v3307_v22 = vld [vmem:[#allocation5 + $0x328] ss:$16 sps:$4 sm:$0xff]  }
  0xc0   :  { %1813 = vmatprep.subr.bf16.mxu1 %v3222_v21  ;;  %1843 = vmatprep.mubr.bf16.mxu1 %v3712_v49  ;;  %v3243_v49 = vld [vmem:[#allocation5 + $0x28c] ss:$16 sps:$4 sm:$0xff]   ;;  %v3304_v21 = vld [vmem:[#allocation5 + $0x108] ss:$16 sps:$4 sm:$0xff]  }
  0xc1   :  { %1762 = vmatmul.mubr.bf16.vlgmr.msra.gmra.mxu0 %v3736_v23 }
  0xc2   :  { %1853 = vmatpush1.bf16.msra.mxu0 %v3223_v25  ;;  %1884 = vmatprep.mubr.bf16.mxu0 %v3714_v52  ;;  %v3247_v52 = vld [vmem:[#allocation5 + $0x268] ss:$16 sps:$4 sm:$0xff]   ;;  %v3315_v25 = vld [vmem:[#allocation5 + $0x4ec] ss:$16 sps:$4 sm:$0xff]  }
  0xc3   :  { %1814 = vmatpush1.bf16.msra.mxu1 %v3220_v24  ;;  %1854 = vmatprep.subr.bf16.mxu0 %v3231_v27  ;;  %v3312_v24 = vld [vmem:[#allocation5 + $0x30c] ss:$16 sps:$4 sm:$0xff]   ;;  %v3313_v27 = vld [vmem:[#allocation5 + $0x4e8] ss:$16 sps:$4 sm:$0xff]  }
  0xc4   :  { %1815 = vmatprep.subr.bf16.mxu1 %v3228_v26  ;;  %v3310_v26 = vld [vmem:[#allocation5 + $0x308] ss:$16 sps:$4 sm:$0xff]  }
  0xc6   :  { %1855 = vmatpush1.bf16.msra.mxu0 %v3229_v29  ;;  %v3321_v29 = vld [vmem:[#allocation5 + $0x6ec] ss:$16 sps:$4 sm:$0xff]  }
  0xc7   :  { %1816 = vmatpush1.bf16.msra.mxu1 %v3226_v28  ;;  %1856 = vmatprep.subr.bf16.mxu0 %v3237_v31  ;;  %v3318_v28 = vld [vmem:[#allocation5 + $0x4cc] ss:$16 sps:$4 sm:$0xff]   ;;  %v3319_v31 = vld [vmem:[#allocation5 + $0x6e8] ss:$16 sps:$4 sm:$0xff]  }
  0xc8   :  { %1817 = vmatprep.subr.bf16.mxu1 %v3234_v30  ;;  %v3316_v30 = vld [vmem:[#allocation5 + $0x4c8] ss:$16 sps:$4 sm:$0xff]  }
  0xca   :  { %1857 = vmatpush1.bf16.msra.mxu0 %v3235_v33  ;;  %v3327_v33 = vld [vmem:[#allocation5 + $0x6cc] ss:$16 sps:$4 sm:$0xff]  }
  0xcb   :  { %1818 = vmatpush1.bf16.msra.mxu1 %v3232_v32  ;;  %1858 = vmatprep.subr.bf16.mxu0 %v3243_v49  ;;  %v3324_v32 = vld [vmem:[#allocation5 + $0x4ac] ss:$16 sps:$4 sm:$0xff]   ;;  %v3325_v49 = vld [vmem:[#allocation5 + $0x6c8] ss:$16 sps:$4 sm:$0xff]  }
  0xcc   :  { %1819 = vmatprep.subr.bf16.mxu1 %v3240_v35  ;;  %v3322_v35 = vld [vmem:[#allocation5 + $0x4a8] ss:$16 sps:$4 sm:$0xff]  }
  0xce   :  { %1859 = vmatpush1.bf16.msra.mxu0 %v3241_v37  ;;  %v3333_v37 = vld [vmem:[#allocation5 + $0x6ac] ss:$16 sps:$4 sm:$0xff]  }
  0xcf   :  { %1820 = vmatpush1.bf16.msra.mxu1 %v3238_v36  ;;  %1860 = vmatprep.subr.bf16.mxu0 %v3249_v40  ;;  %v3330_v36 = vld [vmem:[#allocation5 + $0x48c] ss:$16 sps:$4 sm:$0xff]  }
  0xd0   :  { %1821 = vmatprep.subr.bf16.mxu1 %v3246_v39  ;;  %v3328_v39 = vld [vmem:[#allocation5 + $0x488] ss:$16 sps:$4 sm:$0xff]   ;;  %v3336_v40 = vld [vmem:[#allocation5 + $0x46c] ss:$16 sps:$4 sm:$0xff]  }
  0xd2   :  { %1861 = vmatpush1.bf16.msra.mxu0 %v3247_v52  ;;  %v3337_v52 = vld [vmem:[#allocation5 + $0x688] ss:$16 sps:$4 sm:$0xff]  }
  0xd3   :  { %1822 = vmatpush1.bf16.msra.mxu1 %v3244_v41  ;;  %1862 = vmatprep.subr.bf16.mxu0 %v3255_v43  ;;  %v3339_v41 = vld [vmem:[#allocation5 + $0x68c] ss:$16 sps:$4 sm:$0xff]   ;;  %v3340_v43 = vld [vmem:[#allocation5 + $0x448] ss:$16 sps:$4 sm:$0xff]  }
  0xd4   :  { %1823 = vmatprep.subr.bf16.mxu1 %v3252_v42  ;;  %v3345_v42 = vld [vmem:[#allocation5 + $0x66c] ss:$16 sps:$4 sm:$0xff]  }
  0xd6   :  { %1863 = vmatpush1.bf16.msra.mxu0 %v3253_v45  ;;  %v3348_v45 = vld [vmem:[#allocation5 + $0x42c] ss:$16 sps:$4 sm:$0xff]  }
  0xd7   :  { %1824 = vmatpush1.bf16.msra.mxu1 %v3250_v44  ;;  %1864 = vmatprep.subr.bf16.mxu0 %v3261_v47  ;;  %v3343_v44 = vld [vmem:[#allocation5 + $0x668] ss:$16 sps:$4 sm:$0xff]  }
  0xd8   :  { %1825 = vmatprep.subr.bf16.mxu1 %v3258_v46  ;;  %v3351_v46 = vld [vmem:[#allocation5 + $0x64c] ss:$16 sps:$4 sm:$0xff]   ;;  %v3349_v47 = vld [vmem:[#allocation5 + $0x648] ss:$16 sps:$4 sm:$0xff]  }
  0xda   :  { %1865 = vmatpush1.bf16.msra.mxu0 %v3259_v50  ;;  %v3357_v50 = vld [vmem:[#allocation5 + $0x62c] ss:$16 sps:$4 sm:$0xff]  }
  0xdb   :  { %1826 = vmatpush1.bf16.msra.mxu1 %v3256_v48  ;;  %1866 = vmatprep.subr.bf16.mxu0 %v3267_v53  ;;  %v3354_v48 = vld [vmem:[#allocation5 + $0x40c] ss:$16 sps:$4 sm:$0xff]   ;;  %v3355_v53 = vld [vmem:[#allocation5 + $0x628] ss:$16 sps:$4 sm:$0xff]  }
  0xdc   :  { %1827 = vmatprep.subr.bf16.mxu1 %v3264_v51  ;;  %v3352_v51 = vld [vmem:[#allocation5 + $0x408] ss:$16 sps:$4 sm:$0xff]  }
  0xde   :  { %1867 = vmatpush1.bf16.msra.mxu0 %v3265_v55  ;;  %v3363_v55 = vld [vmem:[#allocation5 + $0x60c] ss:$16 sps:$4 sm:$0xff]  }
  0xdf   :  { %1828 = vmatpush2.bf16.msra.mxu1 %v3262_v54  ;;  %1868 = vmatprep.subr.bf16.mxu0 %v3273_v57  ;;  %v3360_v54 = vld [vmem:[#allocation5 + $0x5ec] ss:$16 sps:$4 sm:$0xff]   ;;  %v3358_v57 = vld [vmem:[#allocation5 + $0x5e8] ss:$16 sps:$4 sm:$0xff]  }
  0xe0   :  { %1829 = vmatprep.subr.bf16.mxu1 %v3270_v56  ;;  %v357_v56 = vld [vmem:[#allocation5 + $0x7c8] sm:$0xff] }
  0xe2   :  { %1869 = vmatpush2.bf16.msra.mxu0 %v3271_v59  ;;  %v3366_v59 = vld [vmem:[#allocation5 + $0x5cc] ss:$16 sps:$4 sm:$0xff]  }
  0xe3   :  { %1830 = vmatpush2.bf16.msra.mxu1 %v3268_v58  ;;  %1870 = vmatprep.subr.bf16.mxu0 %v3279_v61  ;;  %v3361_v58 = vld [vmem:[#allocation5 + $0x608] ss:$16 sps:$4 sm:$0xff]   ;;  %v2908_v61 = vcombine.low %v357_v56, %v357_v56 }
  0xe4   :  { %1831 = vmatprep.subr.bf16.mxu1 %v3276_v60  ;;  %v2909_v60 = vcombine.high %v357_v56, %v357_v56  ;;  %v3426_v56 = vld [vmem:[#allocation8] ss:$8 sps:$4 sm:$0xff]  }
  0xe6   :  { %1871 = vmatpush2.bf16.msra.mxu0 %v3277_v63  ;;  %v1642_v63 = vsel %vm1634_vm1, %v2908_v61, 0  ;;  %v3468_v61 = vld [vmem:[#allocation8 + $0x120] ss:$8 sps:$4 sm:$0xff]  }
  0xe7   :  { %1832 = vmatpush2.bf16.msra.mxu1 %v3274_v62  ;;  %1872 = vmatprep.subr.bf16.mxu0 %v3285_v1  ;;  %v3364_v62 = vld [vmem:[#allocation5 + $0x5c8] ss:$16 sps:$4 sm:$0xff]   ;;  %v3374_v1 = vld [vmem:[#allocation5 + $0x7ac] ss:$16 sps:$4 sm:$0xff]  }
  0xe8   :  { %1833 = vmatprep.subr.bf16.mxu1 %v3282_v0  ;;  %v3371_v0 = vld [vmem:[#allocation5 + $0x5ac] ss:$16 sps:$4 sm:$0xff]  }
  0xea   :  { %1873 = vmatpush2.bf16.msra.mxu0 %v3283_v3  ;;  %v3372_v3 = vld [vmem:[#allocation5 + $0x7a8] ss:$16 sps:$4 sm:$0xff]  }
  0xeb   :  { %1834 = vmatpush2.bf16.msra.mxu1 %v3280_v2  ;;  %1874 = vmatprep.subr.bf16.mxu0 %v3291_v5  ;;  %v3369_v2 = vld [vmem:[#allocation5 + $0x5a8] ss:$16 sps:$4 sm:$0xff]   ;;  %v3380_v5 = vld [vmem:[#allocation5 + $0x78c] ss:$16 sps:$4 sm:$0xff]  }
  0xec   :  { %1835 = vmatprep.subr.bf16.mxu1 %v3288_v4  ;;  %v3377_v4 = vld [vmem:[#allocation5 + $0x58c] ss:$16 sps:$4 sm:$0xff]  }
  0xee   :  { %1875 = vmatpush2.bf16.msra.mxu0 %v3289_v7  ;;  %v3378_v7 = vld [vmem:[#allocation5 + $0x788] ss:$16 sps:$4 sm:$0xff]  }
  0xef   :  { %1836 = vmatpush2.bf16.msra.mxu1 %v3286_v6  ;;  %1876 = vmatprep.subr.bf16.mxu0 %v3297_v11  ;;  %v3375_v6 = vld [vmem:[#allocation5 + $0x588] ss:$16 sps:$4 sm:$0xff]   ;;  %v3386_v11 = vld [vmem:[#allocation5 + $0x76c] ss:$16 sps:$4 sm:$0xff]  }
  0xf0   :  { %1837 = vmatprep.subr.bf16.mxu1 %v3294_v10  ;;  %v3383_v10 = vld [vmem:[#allocation5 + $0x56c] ss:$16 sps:$4 sm:$0xff]  }
  0xf2   :  { %1877 = vmatpush2.bf16.msra.mxu0 %v3295_v13  ;;  %v3384_v13 = vld [vmem:[#allocation5 + $0x768] ss:$16 sps:$4 sm:$0xff]  }
  0xf3   :  { %1838 = vmatpush2.bf16.msra.mxu1 %v3292_v12  ;;  %1878 = vmatprep.subr.bf16.mxu0 %v3303_v15  ;;  %v3381_v12 = vld [vmem:[#allocation5 + $0x568] ss:$16 sps:$4 sm:$0xff]   ;;  %v3392_v15 = vld [vmem:[#allocation5 + $0x74c] ss:$16 sps:$4 sm:$0xff]  }
  0xf4   :  { %1839 = vmatprep.subr.bf16.mxu1 %v3300_v14  ;;  %v3389_v14 = vld [vmem:[#allocation5 + $0x54c] ss:$16 sps:$4 sm:$0xff]  }
  0xf6   :  { %1879 = vmatpush2.bf16.msra.mxu0 %v3301_v17  ;;  %v3390_v17 = vld [vmem:[#allocation5 + $0x748] ss:$16 sps:$4 sm:$0xff]  }
  0xf7   :  { %1840 = vmatpush2.bf16.msra.mxu1 %v3298_v16  ;;  %1880 = vmatprep.subr.bf16.mxu0 %v3309_v20  ;;  %v3387_v16 = vld [vmem:[#allocation5 + $0x548] ss:$16 sps:$4 sm:$0xff]   ;;  %v3398_v20 = vld [vmem:[#allocation5 + $0x72c] ss:$16 sps:$4 sm:$0xff]  }
  0xf8   :  { %1841 = vmatprep.subr.bf16.mxu1 %v3306_v19  ;;  %v3395_v19 = vld [vmem:[#allocation5 + $0x52c] ss:$16 sps:$4 sm:$0xff]  }
  0xfa   :  { %1881 = vmatpush2.bf16.msra.mxu0 %v3307_v22  ;;  %v3396_v22 = vld [vmem:[#allocation5 + $0x728] ss:$16 sps:$4 sm:$0xff]  }
  0xfb   :  { %1842 = vmatpush2.bf16.msra.mxu1 %v3304_v21  ;;  %1882 = vmatprep.subr.bf16.mxu0 %v3312_v24  ;;  %v3393_v21 = vld [vmem:[#allocation5 + $0x528] ss:$16 sps:$4 sm:$0xff]   ;;  %v3401_v24 = vld [vmem:[#allocation5 + $0x50c] ss:$16 sps:$4 sm:$0xff]  }
  0xfc   :  { %1893 = vmatprep.subr.bf16.mxu1 %v3315_v25  ;;  %v3404_v25 = vld [vmem:[#allocation5 + $0x70c] ss:$16 sps:$4 sm:$0xff]  }
  0xfe   :  { %1844 = vmatmul.mubr.bf16.vlgmr.msra.gmra.mxu1 %v3718_v8  ;;  %1883 = vmatpush2.bf16.msra.mxu0 %v3310_v26  ;;  %v3331_v8 = vld [vmem:[#allocation5 + $0x6a8] ss:$16 sps:$4 sm:$0xff]  }
  0xff   :  { %1894 = vmatpush1.bf16.msra.mxu1 %v3313_v27  ;;  %1934 = vmatprep.subr.bf16.mxu0 %v3321_v29  ;;  %v3399_v26 = vld [vmem:[#allocation5 + $0x508] ss:$16 sps:$4 sm:$0xff]   ;;  %v3405_v29 = vld [vmem:[#allocation8 + $0x70] ss:$8 sps:$4 sm:$0xff]  }
 0x100   :  { %1895 = vmatprep.subr.bf16.mxu1 %v3318_v28  ;;  %1925 = vmatprep.mubr.bf16.mxu1 %v3728_v38  ;;  %v3334_v38 = vld [vmem:[#allocation5 + $0x468] ss:$16 sps:$4 sm:$0xff]  }
 0x101   :  { %1885 = vmatmul.mubr.bf16.vlgmr.msra.gmra.mxu0 %v3720_v9  ;;  %v3342_v9 = vld [vmem:[#allocation5 + $0x44c] ss:$16 sps:$4 sm:$0xff]   ;;  %v3402_v27 = vld [vmem:[#allocation5 + $0x708] ss:$16 sps:$4 sm:$0xff]  }
 0x102   :  { %1935 = vmatpush1.bf16.msra.mxu0 %v3319_v31  ;;  %2913 = vmatprep.mubr.msk.bf16.mxu0 %vm1630_vm0, %v3724_v34  ;;  %v3346_v34 = vld [vmem:[#allocation5 + $0x428] ss:$16 sps:$4 sm:$0xff]   ;;  %v3408_v31 = vld [vmem:[#allocation8 + $0x60] ss:$8 sps:$4 sm:$0xff]  }
 0x103   :  { %1896 = vmatpush1.bf16.msra.mxu1 %v3316_v30  ;;  %1936 = vmatprep.subr.bf16.mxu0 %v3327_v33  ;;  %v3407_v28 = vld [vmem:[#allocation8 + $0x74] ss:$8 sps:$4 sm:$0xff]   ;;  %v3410_v30 = vld [vmem:[#allocation8 + $0x64] ss:$8 sps:$4 sm:$0xff]  }
 0x104   :  { %1897 = vmatprep.subr.bf16.mxu1 %v3324_v32  ;;  %v3413_v32 = vld [vmem:[#allocation8 + $0x54] ss:$8 sps:$4 sm:$0xff]  }
 0x106   :  { %1937 = vmatpush1.bf16.msra.mxu0 %v3325_v49  ;;  %v3411_v49 = vld [vmem:[#allocation8 + $0x50] ss:$8 sps:$4 sm:$0xff]  }
 0x107   :  { %1898 = vmatpush1.bf16.msra.mxu1 %v3322_v35  ;;  %1938 = vmatprep.subr.bf16.mxu0 %v3333_v37 }
 0x108   :  { %1899 = vmatprep.subr.bf16.mxu1 %v3330_v36 }
 0x10a   :  { %1939 = vmatpush1.bf16.msra.mxu0 %v3331_v8 }
 0x10b   :  { %1900 = vmatpush1.bf16.msra.mxu1 %v3328_v39  ;;  %1940 = vmatprep.subr.bf16.mxu0 %v3339_v41  ;;  %v3416_v39 = vld [vmem:[#allocation8 + $0x44] ss:$8 sps:$4 sm:$0xff]  }
 0x10c   :  { %1901 = vmatprep.subr.bf16.mxu1 %v3336_v40 }
 0x10e   :  { %1941 = vmatpush1.bf16.msra.mxu0 %v3337_v52  ;;  %v3453_v52 = vld [vmem:[#allocation8 + $0x170] ss:$8 sps:$4 sm:$0xff]  }
 0x10f   :  { %1902 = vmatpush1.bf16.msra.mxu1 %v3334_v38  ;;  %1942 = vmatprep.subr.bf16.mxu0 %v3345_v42  ;;  %v3419_v38 = vld [vmem:[#allocation8 + $0x34] ss:$8 sps:$4 sm:$0xff]   ;;  %v3458_v42 = vld [vmem:[#allocation8 + $0x164] ss:$8 sps:$4 sm:$0xff]  }
 0x110   :  { %1903 = vmatprep.subr.bf16.mxu1 %v3342_v9  ;;  %v3455_v9 = vld [vmem:[#allocation8 + $0x174] ss:$8 sps:$4 sm:$0xff]  }
 0x112   :  { %1943 = vmatpush1.bf16.msra.mxu0 %v3343_v44  ;;  %v3456_v44 = vld [vmem:[#allocation8 + $0x160] ss:$8 sps:$4 sm:$0xff]  }
 0x113   :  { %1904 = vmatpush1.bf16.msra.mxu1 %v3340_v43  ;;  %1944 = vmatprep.subr.bf16.mxu0 %v3351_v46  ;;  %v3417_v43 = vld [vmem:[#allocation8 + $0x30] ss:$8 sps:$4 sm:$0xff]   ;;  %v3461_v46 = vld [vmem:[#allocation8 + $0x154] ss:$8 sps:$4 sm:$0xff]  }
 0x114   :  { %1905 = vmatprep.subr.bf16.mxu1 %v3348_v45  ;;  %v3422_v45 = vld [vmem:[#allocation8 + $0x24] ss:$8 sps:$4 sm:$0xff]  }
 0x116   :  { %1945 = vmatpush1.bf16.msra.mxu0 %v3349_v47  ;;  %v3459_v47 = vld [vmem:[#allocation8 + $0x150] ss:$8 sps:$4 sm:$0xff]  }
 0x117   :  { %1906 = vmatpush1.bf16.msra.mxu1 %v3346_v34  ;;  %1946 = vmatprep.subr.bf16.mxu0 %v3357_v50  ;;  %v3420_v34 = vld [vmem:[#allocation8 + $0x20] ss:$8 sps:$4 sm:$0xff]   ;;  %v3464_v50 = vld [vmem:[#allocation8 + $0x144] ss:$8 sps:$4 sm:$0xff]  }
 0x118   :  { %1907 = vmatprep.subr.bf16.mxu1 %v3354_v48  ;;  %v3425_v48 = vld [vmem:[#allocation8 + $0x14] ss:$8 sps:$4 sm:$0xff]  }
 0x11a   :  { %1947 = vmatpush1.bf16.msra.mxu0 %v3355_v53  ;;  %v3462_v53 = vld [vmem:[#allocation8 + $0x140] ss:$8 sps:$4 sm:$0xff]  }
 0x11b   :  { %1908 = vmatpush1.bf16.msra.mxu1 %v3352_v51  ;;  %1948 = vmatprep.subr.bf16.mxu0 %v3363_v55  ;;  %v3423_v51 = vld [vmem:[#allocation8 + $0x10] ss:$8 sps:$4 sm:$0xff]   ;;  %v3467_v55 = vld [vmem:[#allocation8 + $0x134] ss:$8 sps:$4 sm:$0xff]  }
 0x11c   :  { %1909 = vmatprep.subr.bf16.mxu1 %v3360_v54  ;;  %v3428_v54 = vld [vmem:[#allocation8 + $0x4] ss:$8 sps:$4 sm:$0xff]  }
 0x11e   :  { %1949 = vmatpush1.bf16.msra.mxu0 %v3361_v58  ;;  %v3431_v58 = vld [vmem:[#allocation8 + $0xf4] ss:$8 sps:$4 sm:$0xff]  }
 0x11f   :  { %1910 = vmatpush2.bf16.msra.mxu1 %v3358_v57  ;;  %2912 = vmatprep.subr.msk.bf16.mxu0 %vm1634_vm1, %v2909_v60  ;;  %v3465_v57 = vld [vmem:[#allocation8 + $0x130] ss:$8 sps:$4 sm:$0xff]  }
 0x120   :  { %1911 = vmatprep.subr.bf16.mxu1 %v3366_v59  ;;  %v3470_v59 = vld [vmem:[#allocation8 + $0x124] ss:$8 sps:$4 sm:$0xff]   ;;  %v3429_v60 = vld [vmem:[#allocation8 + $0xf0] ss:$8 sps:$4 sm:$0xff]  }
 0x122   :  { %1953 = vmatpush2.bf16.msra.mxu0 %v1642_v63  ;;  %v3473_v63 = vld [vmem:[#allocation8 + $0x114] ss:$8 sps:$4 sm:$0xff]  }
 0x123   :  { %1912 = vmatpush2.bf16.msra.mxu1 %v3364_v62  ;;  %1954 = vmatprep.subr.bf16.mxu0 %v3374_v1  ;;  %v3434_v62 = vld [vmem:[#allocation8 + $0xe4] ss:$8 sps:$4 sm:$0xff]   ;;  %v3471_v1 = vld [vmem:[#allocation8 + $0x110] ss:$8 sps:$4 sm:$0xff]  }
 0x124   :  { %1913 = vmatprep.subr.bf16.mxu1 %v3371_v0  ;;  %v3432_v0 = vld [vmem:[#allocation8 + $0xe0] ss:$8 sps:$4 sm:$0xff]  }
 0x126   :  { %1955 = vmatpush2.bf16.msra.mxu0 %v3372_v3  ;;  %v3476_v3 = vld [vmem:[#allocation8 + $0x104] ss:$8 sps:$4 sm:$0xff]  }
 0x127   :  { %1914 = vmatpush2.bf16.msra.mxu1 %v3369_v2  ;;  %1956 = vmatprep.subr.bf16.mxu0 %v3380_v5  ;;  %v3437_v2 = vld [vmem:[#allocation8 + $0xd4] ss:$8 sps:$4 sm:$0xff]   ;;  %v3474_v5 = vld [vmem:[#allocation8 + $0x100] ss:$8 sps:$4 sm:$0xff]  }
 0x128   :  { %1915 = vmatprep.subr.bf16.mxu1 %v3377_v4  ;;  %v3435_v4 = vld [vmem:[#allocation8 + $0xd0] ss:$8 sps:$4 sm:$0xff]  }
 0x12a   :  { %1957 = vmatpush2.bf16.msra.mxu0 %v3378_v7  ;;  %v3479_v7 = vld [vmem:[#allocation8 + $0x1f4] ss:$8 sps:$4 sm:$0xff]  }
 0x12b   :  { %1916 = vmatpush2.bf16.msra.mxu1 %v3375_v6  ;;  %1958 = vmatprep.subr.bf16.mxu0 %v3386_v11  ;;  %v3440_v6 = vld [vmem:[#allocation8 + $0xc4] ss:$8 sps:$4 sm:$0xff]   ;;  %v3477_v11 = vld [vmem:[#allocation8 + $0x1f0] ss:$8 sps:$4 sm:$0xff]  }
 0x12c   :  { %1917 = vmatprep.subr.bf16.mxu1 %v3383_v10  ;;  %v3438_v10 = vld [vmem:[#allocation8 + $0xc0] ss:$8 sps:$4 sm:$0xff]  }
 0x12e   :  { %1959 = vmatpush2.bf16.msra.mxu0 %v3384_v13  ;;  %v3482_v13 = vld [vmem:[#allocation8 + $0x1e4] ss:$8 sps:$4 sm:$0xff]  }
 0x12f   :  { %1918 = vmatpush2.bf16.msra.mxu1 %v3381_v12  ;;  %1960 = vmatprep.subr.bf16.mxu0 %v3392_v15  ;;  %v3443_v12 = vld [vmem:[#allocation8 + $0xb4] ss:$8 sps:$4 sm:$0xff]   ;;  %v3480_v15 = vld [vmem:[#allocation8 + $0x1e0] ss:$8 sps:$4 sm:$0xff]  }
 0x130   :  { %1919 = vmatprep.subr.bf16.mxu1 %v3389_v14  ;;  %v3441_v14 = vld [vmem:[#allocation8 + $0xb0] ss:$8 sps:$4 sm:$0xff]  }
 0x132   :  { %1961 = vmatpush2.bf16.msra.mxu0 %v3390_v17  ;;  %v3485_v17 = vld [vmem:[#allocation8 + $0x1d4] ss:$8 sps:$4 sm:$0xff]  }
 0x133   :  { %1920 = vmatpush2.bf16.msra.mxu1 %v3387_v16  ;;  %1962 = vmatprep.subr.bf16.mxu0 %v3398_v20  ;;  %v3446_v16 = vld [vmem:[#allocation8 + $0xa4] ss:$8 sps:$4 sm:$0xff]   ;;  %v3444_v20 = vld [vmem:[#allocation8 + $0xa0] ss:$8 sps:$4 sm:$0xff]  }
 0x134   :  { %1921 = vmatprep.subr.bf16.mxu1 %v3395_v19  ;;  %v360_v19 = vlaneseq }
 0x136   :  { %1963 = vmatpush2.bf16.msra.mxu0 %v3396_v22  ;;  %v3449_v22 = vld [vmem:[#allocation8 + $0x94] ss:$8 sps:$4 sm:$0xff]  }
 0x137   :  { %1922 = vmatpush2.bf16.msra.mxu1 %v3393_v21  ;;  %1964 = vmatprep.subr.bf16.mxu0 %v3404_v25  ;;  %v3483_v21 = vld [vmem:[#allocation8 + $0x1d0] ss:$8 sps:$4 sm:$0xff]   ;;  %v3758_v25 = vshrl.u32 %v360_v19, 7 }
 0x138   :  { %1923 = vmatprep.subr.bf16.mxu1 %v3401_v24  ;;  %v3488_v24 = vld [vmem:[#allocation8 + $0x1c4] ss:$8 sps:$4 sm:$0xff]  }
 0x13a   :  { %1965 = vmatpush2.bf16.msra.mxu0 %v3402_v27  ;;  %v3486_v27 = vld [vmem:[#allocation8 + $0x1c0] ss:$8 sps:$4 sm:$0xff]  }
 0x13b   :  { %1924 = vmatpush2.bf16.msra.mxu1 %v3399_v26  ;;  %2379 = vmatprep.subr.bf16.mxu0 %v3407_v28  ;;  %v3447_v26 = vld [vmem:[#allocation8 + $0x90] ss:$8 sps:$4 sm:$0xff]   ;;  %v3452_v28 = vld [vmem:[#allocation8 + $0x84] ss:$8 sps:$4 sm:$0xff]  }
 0x13c   :  { %2420 = vmatprep.subr.bf16.mxu1 %v3455_v9 }
 0x13d   :  { %1967 = vmatmul.mubr.bf16.vlgmr.msra.gmra.mxu0 %v3733_v18  ;;  %v3414_v18 = vld [vmem:[#allocation8 + $0x40] ss:$8 sps:$4 sm:$0xff]  }
 0x13e   :  { %1926 = vmatmul.mubr.bf16.vlgmr.msra.gmra.mxu1 %v3736_v23  ;;  %2380 = vmatpush1.bf16.msra.mxu0 %v3405_v29  ;;  %v3491_v29 = vld [vmem:[#allocation8 + $0x1b4] ss:$8 sps:$4 sm:$0xff]  }
 0x13f   :  { %2381 = vmatprep.subr.bf16.mxu0 %v3410_v30  ;;  %2421 = vmatpush1.bf16.msra.mxu1 %v3453_v52  ;;  %v362_v30 = vsub.s32 0, %v3758_v25 }
 0x140   :  { %2422 = vmatprep.subr.bf16.mxu1 %v3458_v42  ;;  %v3497_v42 = vld [vmem:[#allocation8 + $0x194] ss:$8 sps:$4 sm:$0xff]  }
 0x141   :  { %v3750_v33 = vpop.f32.mrf.mxu0 }
 0x142   :  { %v3752_v35 = vpop.f32.mrf.mxu1  ;;  %2382 = vmatpush1.bf16.msra.mxu0 %v3408_v31  ;;  %v3761_v31 = vld [vmem:[#allocation7] sm:$0xf] }
 0x143   :  { %v3754_v36 = vpop.f32.mrf.mxu0  ;;  %2383 = vmatprep.subr.bf16.mxu0 %v3413_v32  ;;  %2423 = vmatpush1.bf16.msra.mxu1 %v3456_v44  ;;  %v366_v32 = vsub.s32 1, %v3758_v25  ;;  %v3495_v44 = vld [vmem:[#allocation8 + $0x190] ss:$8 sps:$4 sm:$0xff]  }
 0x144   :  { %v3756_v37 = vpop.f32.mrf.mxu1  ;;  %2424 = vmatprep.subr.bf16.mxu1 %v3461_v46 }
 0x145   :  { %v1685_v8 = vpop.f32.mrf.mxu0 }
 0x146   :  { %v1726_v23 = vpop.f32.mrf.mxu1  ;;  %2384 = vmatpush1.bf16.msra.mxu0 %v3411_v49  ;;  %v3450_v49 = vld [vmem:[#allocation8 + $0x80] ss:$8 sps:$4 sm:$0xff]   ;;  %v363_v8 = vrot.slane %v3761_v31, %v362_v30 }
 0x147   :  { %v1686_v40 = vpop.f32.mrf.mxu0  ;;  %2385 = vmatprep.subr.bf16.mxu0 %v3416_v39  ;;  %2425 = vmatpush1.bf16.msra.mxu1 %v3459_v47  ;;  %v3489_v39 = vld [vmem:[#allocation8 + $0x1b0] ss:$8 sps:$4 sm:$0xff]   ;;  %v367_v23 = vrot.slane %v3761_v31, %v366_v32 }
 0x148   :  { %v1727_v41 = vpop.f32.mrf.mxu1  ;;  %2426 = vmatprep.subr.bf16.mxu1 %v3464_v50  ;;  %v1682_v40 = vadd.f32 %v3750_v33, %v363_v8  ;;  %v3500_v50 = vld [vmem:[#allocation8 + $0x184] ss:$8 sps:$4 sm:$0xff]  }
 0x149   :  { %v3492_v41 = vld [vmem:[#allocation8 + $0x1a0] ss:$8 sps:$4 sm:$0xff]   ;;  %v1684_v52 = vadd.f32 %v3754_v36, %v367_v23 }
 0x14a   :  { %2386 = vmatpush1.bf16.msra.mxu0 %v3414_v18  ;;  %v3494_v18 = vld [vmem:[#allocation8 + $0x1a4] ss:$8 sps:$4 sm:$0xff]  }
 0x14b   :  { %2387 = vmatprep.subr.bf16.mxu0 %v3419_v38  ;;  %2427 = vmatpush1.bf16.msra.mxu1 %v3462_v53 }
 0x14c   :  { %2428 = vmatprep.subr.bf16.mxu1 %v3467_v55 }
 0x14e   :  { %2388 = vmatpush1.bf16.msra.mxu0 %v3417_v43  ;;  %v1723_v43 = vadd.f32 %v3752_v35, %v1682_v40 }
 0x14f   :  { %2389 = vmatprep.subr.bf16.mxu0 %v3422_v45  ;;  %2429 = vmatpush1.bf16.msra.mxu1 %v3465_v57 }
 0x150   :  { %2430 = vmatprep.subr.bf16.mxu1 %v3470_v59 }
 0x152   :  { %2390 = vmatpush1.bf16.msra.mxu0 %v3420_v34  ;;  %v1725_v34 = vadd.f32 %v3756_v37, %v1684_v52 }
 0x153   :  { %2391 = vmatprep.subr.bf16.mxu0 %v3425_v48  ;;  %2431 = vmatpush1.bf16.msra.mxu1 %v3468_v61 }
 0x154   :  { %2432 = vmatprep.subr.bf16.mxu1 %v3473_v63 }
 0x156   :  { %2392 = vmatpush1.bf16.msra.mxu0 %v3423_v51 }
 0x157   :  { %2393 = vmatprep.subr.bf16.mxu0 %v3428_v54  ;;  %2433 = vmatpush1.bf16.msra.mxu1 %v3471_v1  ;;  %v3498_v54 = vld [vmem:[#allocation8 + $0x180] ss:$8 sps:$4 sm:$0xff]  }
 0x158   :  { %2434 = vmatprep.subr.bf16.mxu1 %v3476_v3  ;;  %v3501_v3 = vld [vmem:[#allocation10 + $0x78] sm:$0xff]  }
 0x15a   :  { %2394 = vmatpush1.bf16.msra.mxu0 %v3426_v56 }
 0x15b   :  { %2395 = vmatprep.subr.bf16.mxu0 %v3431_v58  ;;  %2435 = vmatpush1.bf16.msra.mxu1 %v3474_v5  ;;  %v3503_v5 = vld [vmem:[#allocation10 + $0x70] sm:$0xff]  }
 0x15c   :  { %2436 = vmatprep.subr.bf16.mxu1 %v3479_v7  ;;  %v3505_v7 = vld [vmem:[#allocation10 + $0x68] sm:$0xff]  }
 0x15e   :  { %2396 = vmatpush2.bf16.msra.mxu0 %v3429_v60 }
 0x15f   :  { %2397 = vmatprep.subr.bf16.mxu0 %v3434_v62  ;;  %2437 = vmatpush2.bf16.msra.mxu1 %v3477_v11  ;;  %v3507_v11 = vld [vmem:[#allocation10 + $0x60] sm:$0xff]  }
 0x160   :  { %2438 = vmatprep.subr.bf16.mxu1 %v3482_v13  ;;  %v3509_v13 = vld [vmem:[#allocation10 + $0x58] sm:$0xff]  }
 0x162   :  { %2398 = vmatpush2.bf16.msra.mxu0 %v3432_v0 }
 0x163   :  { %2399 = vmatprep.subr.bf16.mxu0 %v3437_v2  ;;  %2439 = vmatpush2.bf16.msra.mxu1 %v3480_v15  ;;  %v3511_v15 = vld [vmem:[#allocation10 + $0x50] sm:$0xff]  }
 0x164   :  { %2440 = vmatprep.subr.bf16.mxu1 %v3485_v17  ;;  %v370_v17 = vsub.s32 2, %v3758_v25 }
 0x166   :  { %2400 = vmatpush2.bf16.msra.mxu0 %v3435_v4  ;;  %v3502_v4 = vld [vmem:[#allocation10 + $0x38] sm:$0xff]   ;;  %v371_v19 = vrot.slane %v3761_v31, %v370_v17 }
 0x167   :  { %2401 = vmatprep.subr.bf16.mxu0 %v3440_v6  ;;  %2441 = vmatpush2.bf16.msra.mxu1 %v3483_v21  ;;  %v3504_v6 = vld [vmem:[#allocation10 + $0x30] sm:$0xff]  }
 0x168   :  { %2442 = vmatprep.subr.bf16.mxu1 %v3488_v24 }
 0x16a   :  { %2402 = vmatpush2.bf16.msra.mxu0 %v3438_v10  ;;  %v3506_v10 = vld [vmem:[#allocation10 + $0x28] sm:$0xff]  }
 0x16b   :  { %2403 = vmatprep.subr.bf16.mxu0 %v3443_v12  ;;  %2443 = vmatpush2.bf16.msra.mxu1 %v3486_v27  ;;  %v3508_v12 = vld [vmem:[#allocation10 + $0x20] sm:$0xff]  }
 0x16c   :  { %2444 = vmatprep.subr.bf16.mxu1 %v3491_v29 }
 0x16e   :  { %2404 = vmatpush2.bf16.msra.mxu0 %v3441_v14  ;;  %v3510_v14 = vld [vmem:[#allocation10 + $0x18] sm:$0xff]  }
 0x16f   :  { %2405 = vmatprep.subr.bf16.mxu0 %v3446_v16  ;;  %2445 = vmatpush2.bf16.msra.mxu1 %v3489_v39  ;;  %v3512_v16 = vld [vmem:[#allocation10 + $0x10] sm:$0xff]  }
 0x170   :  { %2446 = vmatprep.subr.bf16.mxu1 %v3494_v18 }
 0x172   :  { %2406 = vmatpush2.bf16.msra.mxu0 %v3444_v20  ;;  %v374_v20 = vsub.s32 3, %v3758_v25  ;;  %v2978_v25 = vld [vmem:[%s3797_s6] ss:$0 sm:$0xff] }
 0x173   :  { %2407 = vmatprep.subr.bf16.mxu0 %v3449_v22  ;;  %2447 = vmatpush2.bf16.msra.mxu1 %v3492_v41 }
 0x174   :  { %2448 = vmatprep.subr.bf16.mxu1 %v3497_v42  ;;  %v375_v22 = vrot.slane %v3761_v31, %v374_v20  ;;  %v3513_v31 = vld [vmem:[#allocation10 + $0x48] sm:$0xff]  }
 0x176   :  { %2408 = vmatpush2.bf16.msra.mxu0 %v3447_v26 }
 0x177   :  { %2409 = vmatprep.subr.bf16.mxu0 %v3452_v28  ;;  %2449 = vmatpush2.bf16.msra.mxu1 %v3495_v44 }
 0x178   :  { %2450 = vmatprep.subr.bf16.mxu1 %v3500_v50 }
 0x17a   :  { %2410 = vmatpush2.bf16.msra.mxu0 %v3450_v49 }
 0x17b   :  { %2451 = vmatpush2.bf16.msra.mxu1 %v3498_v54  ;;  %2995 = vmatprep.subr.bf16.mxu0 %v3501_v3 }
 0x17e   :  { %v1804_v38 = vpop.f32.mrf.mxu1 }
 0x180   :  { %v1806_v9 = vpop.f32.mrf.mxu1 }
 0x181   :  { %v1763_v45 = vpop.f32.mrf.mxu0 }
 0x182   :  { %v1808_v46 = vpop.f32.mrf.mxu1  ;;  %v1764_v47 = vadd.f32 %v1763_v45, %v1723_v43 }
 0x183   :  { %v1765_v48 = vpop.f32.mrf.mxu0  ;;  %v3514_v46 = vld [vmem:[#allocation10 + $0x8] sm:$0xff]  }
 0x184   :  { %v1809_v33 = vpop.f32.mrf.mxu1  ;;  %v1805_v51 = vadd.f32 %v1804_v38, %v1764_v47  ;;  %v1766_v53 = vadd.f32 %v1765_v48, %v1725_v34  ;;  %v3515_v47 = vld [vmem:[#allocation10 + $0x40] sm:$0xff]  }
 0x185   :  { %v1767_v36 = vpop.f32.mrf.mxu0  ;;  %v3516_v48 = vld [vmem:[#allocation10] sm:$0xff]  }
 0x186   :  { %v1807_v55 = vadd.f32 %v1806_v9, %v1766_v53  ;;  %v1975_v56 = vmax.f32 %v1805_v51, 0.0  ;;  %v2047_v53 = vld [vmem:[%s3795_s4] sm:$0x3] }
 0x187   :  { %v1768_v35 = vpop.f32.mrf.mxu0  ;;  %v2052_v54 = vrot.slane %v2047_v53, %v362_v30  ;;  %v2056_v36 = vrot.slane %v2047_v53, %v366_v32 }
 0x188   :  { %v1976_v57 = vmax.f32 %v1807_v55, 0.0  ;;  %v1979_v59 = vpack.c.bf16 %v1975_v56, %v1975_v56 }
 0x18a   :  { %v1980_v58 = vpack.c.bf16 %v1976_v57, %v1976_v57 }
 0x18c   :  { %2411 = vmatprep.mubr.bf16.mxu0 %v1980_v58 }
 0x18d   :  { %2412 = vmatmul.mubr.bf16.vlgmr.msra.gmra.mxu0 %v1979_v59 }
 0x18e   :  { %2996 = vmatpush3.bf16.msra.mxu0 %v3502_v4 }
 0x18f   :  { %2997 = vmatprep.subr.bf16.mxu0 %v3503_v5 }
 0x192   :  { %2998 = vmatpush3.bf16.msra.mxu0 %v3504_v6 }
 0x193   :  { %2999 = vmatprep.subr.bf16.mxu0 %v3505_v7 }
 0x196   :  { %3000 = vmatpush3.bf16.msra.mxu0 %v3506_v10 }
 0x197   :  { %3001 = vmatprep.subr.bf16.mxu0 %v3507_v11 }
 0x19a   :  { %3002 = vmatpush3.bf16.msra.mxu0 %v3508_v12 }
 0x19b   :  { %3003 = vmatprep.subr.bf16.mxu0 %v3509_v13 }
 0x19e   :  { %3004 = vmatpush3.bf16.msra.mxu0 %v3510_v14 }
 0x19f   :  { %3005 = vmatprep.subr.bf16.mxu0 %v3511_v15 }
 0x1a2   :  { %3006 = vmatpush3.bf16.msra.mxu0 %v3512_v16 }
 0x1a3   :  { %3007 = vmatprep.subr.bf16.mxu0 %v3513_v31 }
 0x1a6   :  { %3008 = vmatpush3.bf16.msra.mxu0 %v3514_v46 }
 0x1a7   :  { %3009 = vmatprep.subr.bf16.mxu0 %v3515_v47 }
 0x1aa   :  { %3010 = vmatpush3.bf16.msra.mxu0 %v3516_v48 }
 0x1be   :  { %v1845_v37 = vpop.f32.mrf.mxu1 }
 0x1bf   :  { %v1846_v21 = vadd.f32 %v1845_v37, %v371_v19 }
 0x1c0   :  { %v1847_v60 = vpop.f32.mrf.mxu1 }
 0x1c1   :  { %v1886_v62 = vpop.f32.mrf.mxu0  ;;  %v1848_v24 = vadd.f32 %v1847_v60, %v375_v22 }
 0x1c2   :  { %v1849_v61 = vpop.f32.mrf.mxu1  ;;  %v1887_v26 = vadd.f32 %v1886_v62, %v1846_v21 }
 0x1c3   :  { %v1888_v0 = vpop.f32.mrf.mxu0 }
 0x1c4   :  { %v1850_v63 = vpop.f32.mrf.mxu1  ;;  %v1889_v29 = vadd.f32 %v1888_v0, %v1848_v24 }
 0x1c5   :  { %v1890_v1 = vpop.f32.mrf.mxu0 }
 0x1c7   :  { %v1891_v2 = vpop.f32.mrf.mxu0 }
 0x1fd   :  { %v1968_v28 = vpop.f32.mrf.mxu0 }
 0x1fe   :  { %v1927_v27 = vpop.f32.mrf.mxu1 }
 0x1ff   :  { %v1928_v49 = vadd.f32 %v1927_v27, %v1887_v26  ;;  %v1970_v8 = vpop.f32.mrf.mxu0 }
 0x200   :  { %v1929_v39 = vpop.f32.mrf.mxu1 }
 0x201   :  { %v1969_v23 = vadd.f32 %v1968_v28, %v1928_v49  ;;  %v1930_v18 = vadd.f32 %v1929_v39, %v1889_v29  ;;  %v1972_v41 = vpop.f32.mrf.mxu0 }
 0x202   :  { %v1931_v40 = vpop.f32.mrf.mxu1 }
 0x203   :  { %v1971_v38 = vadd.f32 %v1970_v8, %v1930_v18  ;;  %v1977_v52 = vmax.f32 %v1969_v23, 0.0  ;;  %v1973_v42 = vpop.f32.mrf.mxu0 }
 0x204   :  { %v1932_v9 = vpop.f32.mrf.mxu1 }
 0x205   :  { %v1978_v43 = vmax.f32 %v1971_v38, 0.0  ;;  %v1981_v45 = vpack.c.bf16 %v1977_v52, %v1977_v52 }
 0x207   :  { %v1982_v44 = vpack.c.bf16 %v1978_v43, %v1978_v43 }
 0x209   :  { %2452 = vmatprep.mubr.bf16.mxu1 %v1982_v44 }
 0x20a   :  { %2453 = vmatmul.mubr.bf16.vlgmr.msra.gmra.mxu1 %v1981_v45 }
 0x24d   :  { %v2413_v34 = vpop.f32.mrf.mxu0 }
 0x24e   :  { %v2414_v55 = vadd.f32 %v2413_v34, %v2052_v54 }
 0x24f   :  { %v2415_v33 = vpop.f32.mrf.mxu0 }
 0x250   :  { %v2416_v35 = vadd.f32 %v2415_v33, %v2056_v36 }
 0x251   :  { %v2417_v50 = vpop.f32.mrf.mxu0 }
 0x253   :  { %v2418_v51 = vpop.f32.mrf.mxu0 }
 0x2ca   :  { %v2454_v56 = vpop.f32.mrf.mxu1 }
 0x2cb   :  { %v2455_v57 = vadd.f32 %v2454_v56, %v2414_v55 }
 0x2cc   :  { %v2456_v58 = vpop.f32.mrf.mxu1 }
 0x2cd   :  { %v2457_v59 = vadd.f32 %v2456_v58, %v2416_v35  ;;  %v2461_v37 = vmax.f32 %v2455_v57, 0.0 }
 0x2ce   :  { %v2458_v60 = vpop.f32.mrf.mxu1 }
 0x2cf   :  { %v2462_v61 = vmax.f32 %v2457_v59, 0.0  ;;  %v2463_v0 = vpack.c.bf16 %v2461_v37, %v2461_v37 }
 0x2d0   :  { %v2459_v62 = vpop.f32.mrf.mxu1 }
 0x2d1   :  { %v2464_v63 = vpack.c.bf16 %v2462_v61, %v2462_v61 }
 0x2d3   :  { %2632 = vmatprep.mubr.bf16.mxu0 %v2464_v63 }
 0x2d4   :  { %2633 = vmatmul.mubr.bf16.vlgmr.msra.gmra.mxu0 %v2463_v0 }
 0x394   :  { %v3011_v1 = vpop.f32.mrf.mxu0 }
 0x396   :  { %v3012_v30 = vpop.f32.mrf.mxu0 }
 0x397   :  { %v3013_v32 = vadd.f32 %v3012_v30, %v3011_v1 }
 0x398   :  { %v3014_v2 = vpop.f32.mrf.mxu0 }
 0x399   :  { %v2635_v3 = vadd.f32 %v3013_v32, %v2978_v25 }
 0x39a   :  { %v3015_v4 = vpop.f32.mrf.mxu0 }
 0x39b   :  { %2640 = vst [vmem:[#allocation11] sm:$0xff] %v2635_v3 }
 0x39c   :  { %3628 = shalt.err (!%p3625_p1)
}
 0x39d   :  { %2650 = dma.vmem_to_hbm [thread:$0]  %s2648_s8, 128, %s3798_s7, [#allocation4]  }
 0x39e   :  { %3643 = dma.done.wait [#allocation4], 128  }
 0x39f   :  { %3644 = vsyncadd [#allocation4], 4294967168 }
 0x3a0   :  { %2654 = vsyncpa [#allocation3], 1 }
 0x3a1   :  { %2655 = vsyncpa [#allocation6], 1 }
 0x3a2   :  { %2656 = vsyncpa [#allocation9], 1 }
 0x3a3   :  { %2657 = vsyncpa [#allocation4], 1 }

</bundles_post_ra>
